<compile_context>
chip_gen: v6e
topology: v6e:2x2x1
jax: 0.10.0
libtpu: 0.0.40
codegen_flags: <defaults>
</compile_context>

<pallas_src>
import functools
import math

import jax
import jax.numpy as jnp
from jax import lax
from jax.experimental import pallas as pl
from jax.experimental.pallas import tpu as pltpu

EMBED_SIZE = 384
N_HEADS = 6
HEAD_SIZE = 64          # n_heads * head_size == embed_size (GPT-style)
SEQ_LEN = 8
BATCH = 2


def _mha_kernel(x_ref, w_qkv_ref, wo_t_ref, bo_ref, out_ref, *,
                batch, seq, n_heads, head_size):
    # x_ref:     (B*T, E)       compute dtype (bf16), batch folded into M
    # w_qkv_ref: (E, 3*NH*H)    fused [Q | K | V] projection weights, lane-dense
    # wo_t_ref:  (NH*H, E)      output projection weight, transposed, lane-dense
    # bo_ref:    (1, E)         output projection bias (f32)
    # out_ref:   (B*T, E)
    B, T, NH, H = batch, seq, n_heads, head_size
    E = x_ref.shape[1]
    C = NH * H
    cdt = x_ref.dtype                      # MXU operand dtype (bf16)
    scale = H ** (-0.5)

    x = x_ref[...]                                                        # (B*T, E)

    # --- ONE fused, lane-dense QKV projection ---
    qkv = jnp.dot(x, w_qkv_ref[...], preferred_element_type=jnp.float32)  # (B*T, 3C) f32
    # Slice + cast immediately so the f32 qkv result dies early (vreg pressure).
    q = qkv[:, 0 * C:1 * C].astype(cdt)    # 128-aligned column slices
    k = qkv[:, 1 * C:2 * C].astype(cdt)
    v = qkv[:, 2 * C:3 * C].astype(cdt)

    # Causal mask: build once as (T, T), broadcast over B (hoisted; JAX does not
    # CSE broadcast_in_dim, so materialize the batched mask a single time).
    row = lax.broadcasted_iota(jnp.int32, (T, T), 0)
    col = lax.broadcasted_iota(jnp.int32, (T, T), 1)
    tril_b = jnp.broadcast_to((col <= row)[None, :, :], (B, T, T))         # (B,T,T) bool

    neg_inf = jnp.float32(-jnp.inf)

    # NOTE: per-head 64-wide slices (odd heads start at lane 64) are kept; at
    # T=8 the XLU has slack, so the relayout / 128-padded-head layouts are not
    # worth it (and are a net loss on v5e).
    head_outs = []
    for h in range(NH):                    # static unroll; attention core is tiny (T=8)
        qh = q[:, h * H:(h + 1) * H].reshape(B, T, H)
        kh = k[:, h * H:(h + 1) * H].reshape(B, T, H)
        vh = v[:, h * H:(h + 1) * H].reshape(B, T, H)

        s = jnp.einsum('btd,bsd->bts', qh, kh,
                       preferred_element_type=jnp.float32) * scale        # (B,T,T) f32

        # Single masking pass: keep s only where (in tril) AND (s != 0); else -inf.
        # Matches tril() followed by masked_fill(tmp == 0, -inf) exactly.
        s = jnp.where(jnp.logical_and(tril_b, s != 0.0), s, neg_inf)

        # Explicit softmax: max-subtract, exp, row-sum, EUP reciprocal multiply.
        m = jnp.max(s, axis=-1, keepdims=True)
        e = jnp.exp(s - m)
        l = jnp.sum(e, axis=-1, keepdims=True)
        p = e * pl.reciprocal(l, approx=True)                             # f32 probs

        oh = jnp.einsum('bts,bsd->btd', p.astype(cdt), vh,
                        preferred_element_type=jnp.float32)                # (B,T,H) f32
        head_outs.append(oh.reshape(B * T, H))

    # Lane-concat the six (B*T, H) blocks -> one (B*T, C) slab, then a single
    # K=384 output-projection matmul (replaces 6 accumulating K=64 dots).
    cat = jnp.concatenate(head_outs, axis=-1).astype(cdt)                  # (B*T, C)
    out = jnp.dot(cat, wo_t_ref[...], preferred_element_type=jnp.float32)  # (B*T, E) f32

    out_ref[...] = (out + bo_ref[...]).astype(out_ref.dtype)


def make_multi_attention_head(wq, wk, wv, wo, bo, *, compute_dtype=jnp.bfloat16):
    """Pack weights ONCE (hoisted out of the per-call path) and return a jitted
    forward closure.

    wq/wk/wv: (n_heads, E, H); wo: (E, n_heads*H); bo: (E,).
    """
    NH, E, H = wq.shape
    C = NH * H

    # Fused, lane-dense QKV weight: columns laid out as [Q(all heads) | K | V],
    # each block head-major so (x @ Wqkv)[:, blk*C + h*H : blk*C + (h+1)*H] == x @ w[h].
    def _flat(w):  # (NH, E, H) -> (E, NH*H)
        return jnp.transpose(w, (1, 0, 2)).reshape(E, C)

    w_qkv = jnp.concatenate([_flat(wq), _flat(wk), _flat(wv)], axis=-1)
    w_qkv = w_qkv.astype(compute_dtype)                  # (E, 3*C)  minor dim 1152
    wo_t = wo.T.astype(compute_dtype)                    # (C, E)    minor dim 384
    bo2 = bo.reshape(1, E).astype(jnp.float32)
    w_qkv, wo_t, bo2 = jax.device_put((w_qkv, wo_t, bo2))  # materialize packed weights once

    vmem = pl.BlockSpec(memory_space=pltpu.MemorySpace.VMEM)

    @jax.jit
    def forward(x):
        B, T, _ = x.shape
        out_dtype = x.dtype
        x2 = x.reshape(B * T, E).astype(compute_dtype)   # fold batch into M

        kernel = functools.partial(_mha_kernel, batch=B, seq=T, n_heads=NH, head_size=H)
        out = pl.pallas_call(
            kernel,
            out_shape=jax.ShapeDtypeStruct((B * T, E), out_dtype),
            in_specs=[vmem, vmem, vmem, vmem],
            out_specs=vmem,
        )(x2, w_qkv, wo_t, bo2)
        # TODO(synk): once B*T grows past ~256 rows, add a leading "parallel"
        # grid axis over query/batch tiles (v7x dual-TC sharding) and switch to
        # flash-style (tq, tk) tiling sized against v7x's 64 MiB VMEM
        # (raise vmem_limit_bytes if above the 32 MiB scoped default).
        return out.reshape(B, T, E)

    return forward


def _reference(x, wq, wk, wv, wo, bo, compute_dtype=jnp.float32):
    """Pure-JAX reference mirroring the PyTorch forward exactly.
    Matmul operands are cast to `compute_dtype`; accumulation/softmax stay f32."""
    cdt = compute_dtype
    NH, _, H = wq.shape
    T = x.shape[1]
    tril = jnp.tril(jnp.ones((T, T), dtype=bool))
    xc = x.astype(cdt)
    outs = []
    for h in range(NH):
        q = jnp.einsum('bte,eh->bth', xc, wq[h].astype(cdt),
                       preferred_element_type=jnp.float32)
        k = jnp.einsum('bte,eh->bth', xc, wk[h].astype(cdt),
                       preferred_element_type=jnp.float32)
        v = jnp.einsum('bte,eh->bth', xc, wv[h].astype(cdt),
                       preferred_element_type=jnp.float32)
        s = jnp.einsum('btd,bsd->bts', q.astype(cdt), k.astype(cdt),
                       preferred_element_type=jnp.float32) * (H ** -0.5)
        s = jnp.where(tril, s, 0.0)
        s = jnp.where(s == 0.0, -jnp.inf, s)
        p = jax.nn.softmax(s, axis=-1)
        outs.append(jnp.einsum('bts,bsd->btd', p.astype(cdt), v.astype(cdt),
                               preferred_element_type=jnp.float32))
    cat = jnp.concatenate(outs, axis=-1)                       # (B, T, NH*H)
    return jnp.einsum('btc,ec->bte', cat.astype(cdt), wo.astype(cdt),
                      preferred_element_type=jnp.float32) + bo


if __name__ == "__main__":
    key = jax.random.PRNGKey(0)
    kx, kq, kk, kv, kw, kb = jax.random.split(key, 6)

    x = jax.random.normal(kx, (BATCH, SEQ_LEN, EMBED_SIZE), dtype=jnp.float32)

    # Deterministic parameter init (uniform, roughly matching nn.Linear's fan-in scaling).
    lim_qkv = 1.0 / math.sqrt(EMBED_SIZE)
    lim_out = 1.0 / math.sqrt(N_HEADS * HEAD_SIZE)
    wq = jax.random.uniform(kq, (N_HEADS, EMBED_SIZE, HEAD_SIZE), jnp.float32, -lim_qkv, lim_qkv)
    wk = jax.random.uniform(kk, (N_HEADS, EMBED_SIZE, HEAD_SIZE), jnp.float32, -lim_qkv, lim_qkv)
    wv = jax.random.uniform(kv, (N_HEADS, EMBED_SIZE, HEAD_SIZE), jnp.float32, -lim_qkv, lim_qkv)
    wo = jax.random.uniform(kw, (EMBED_SIZE, N_HEADS * HEAD_SIZE), jnp.float32, -lim_out, lim_out)
    bo = jax.random.uniform(kb, (EMBED_SIZE,), jnp.float32, -lim_out, lim_out)

    mha = make_multi_attention_head(wq, wk, wv, wo, bo)    # weights packed once here
    out = mha(x)                                           # bf16 matmuls, f32 accum/softmax
    out = jax.block_until_ready(out)
    assert out.shape == (BATCH, SEQ_LEN, EMBED_SIZE)

    # Precision-matched reference (same bf16 matmul operands) -> tight check.
    ref_bf16 = _reference(x, wq, wk, wv, wo, bo, compute_dtype=jnp.bfloat16)
    assert jnp.allclose(out, ref_bf16, atol=5e-3, rtol=5e-3)

    # Full-f32 module reference -> sanity check with bf16-appropriate tolerance.
    ref_f32 = _reference(x, wq, wk, wv, wo, bo, compute_dtype=jnp.float32)
    assert jnp.allclose(out, ref_f32, atol=3e-2, rtol=3e-2)

    print("KERNEL_OK")
</pallas_src>

<mosaic_0001>
module attributes {stable_mosaic.version = 11 : i64} {
  func.func @_mha_kernel(%arg0: memref<16x384xbf16, #tpu.memory_space<vmem>>, %arg1: memref<384x1152xbf16, #tpu.memory_space<vmem>>, %arg2: memref<384x384xbf16, #tpu.memory_space<vmem>>, %arg3: memref<1x384xf32, #tpu.memory_space<vmem>>, %arg4: memref<16x384xf32, #tpu.memory_space<vmem>>) attributes {dimension_semantics = [], scalar_prefetch = 0 : i64, scratch_operands = 0 : i64, tpu.core_type = #tpu.core_type<tc>} {
    %c0 = arith.constant 0 : index
    %c0_0 = arith.constant 0 : index
    %0 = vector.load %arg0[%c0, %c0_0] : memref<16x384xbf16, #tpu.memory_space<vmem>>, vector<16x384xbf16>
    %c0_1 = arith.constant 0 : index
    %c0_2 = arith.constant 0 : index
    %1 = vector.load %arg1[%c0_1, %c0_2] : memref<384x1152xbf16, #tpu.memory_space<vmem>>, vector<384x1152xbf16>
    %cst = arith.constant dense<0.000000e+00> : vector<16x1152xf32>
    %2 = tpu.matmul %0, %1, %cst {dimension_numbers = #tpu.dot_dimension_numbers<[1], [0], [0], [1], [0, 0, 1, 1], [], []>} : vector<16x384xbf16>, vector<384x1152xbf16>, vector<16x1152xf32> -> vector<16x1152xf32>
    %3 = vector.extract_strided_slice %2 {offsets = [0, 0], sizes = [16, 384], strides = [1, 1]} : vector<16x1152xf32> to vector<16x384xf32>
    %4 = arith.truncf %3 : vector<16x384xf32> to vector<16x384xbf16>
    %5 = vector.extract_strided_slice %2 {offsets = [0, 384], sizes = [16, 384], strides = [1, 1]} : vector<16x1152xf32> to vector<16x384xf32>
    %6 = arith.truncf %5 : vector<16x384xf32> to vector<16x384xbf16>
    %7 = vector.extract_strided_slice %2 {offsets = [0, 768], sizes = [16, 384], strides = [1, 1]} : vector<16x1152xf32> to vector<16x384xf32>
    %8 = arith.truncf %7 : vector<16x384xf32> to vector<16x384xbf16>
    %9 = tpu.iota {dimensions = array<i32: 0>} : vector<8x8xi32>
    %10 = tpu.iota {dimensions = array<i32: 1>} : vector<8x8xi32>
    %11 = arith.cmpi sle, %10, %9 : vector<8x8xi32>
    %12 = vector.shape_cast %11 : vector<8x8xi1> to vector<1x8x8xi1>
    %13 = vector.shape_cast %12 : vector<1x8x8xi1> to vector<1x8x8xi1>
    %14 = vector.broadcast %13 : vector<1x8x8xi1> to vector<2x8x8xi1>
    %15 = vector.extract_strided_slice %4 {offsets = [0, 0], sizes = [16, 64], strides = [1, 1]} : vector<16x384xbf16> to vector<16x64xbf16>
    %16 = vector.shape_cast %15 : vector<16x64xbf16> to vector<2x8x64xbf16>
    %17 = vector.extract_strided_slice %6 {offsets = [0, 0], sizes = [16, 64], strides = [1, 1]} : vector<16x384xbf16> to vector<16x64xbf16>
    %18 = vector.shape_cast %17 : vector<16x64xbf16> to vector<2x8x64xbf16>
    %19 = vector.extract_strided_slice %8 {offsets = [0, 0], sizes = [16, 64], strides = [1, 1]} : vector<16x384xbf16> to vector<16x64xbf16>
    %20 = vector.shape_cast %19 : vector<16x64xbf16> to vector<2x8x64xbf16>
    "tpu.trace_start"() <{level = 10 : i32, message = "btd,bsd->bts"}> : () -> ()
    %cst_3 = arith.constant dense<0.000000e+00> : vector<2x8x8xf32>
    %21 = tpu.matmul %16, %18, %cst_3 {dimension_numbers = #tpu.dot_dimension_numbers<[2], [2], [1], [1], [0, 0, 0, 1, 1, 1], [0], [0]>} : vector<2x8x64xbf16>, vector<2x8x64xbf16>, vector<2x8x8xf32> -> vector<2x8x8xf32>
    "tpu.trace_stop"() : () -> ()
    %cst_4 = arith.constant 1.250000e-01 : f32
    %22 = vector.broadcast %cst_4 : f32 to vector<2x8x8xf32>
    %23 = arith.mulf %21, %22 : vector<2x8x8xf32>
    %cst_5 = arith.constant 0.000000e+00 : f32
    %24 = vector.broadcast %cst_5 : f32 to vector<2x8x8xf32>
    %25 = arith.cmpf one, %23, %24 : vector<2x8x8xf32>
    %26 = arith.andi %14, %25 : vector<2x8x8xi1>
    %cst_6 = arith.constant 0xFF800000 : f32
    %27 = vector.broadcast %cst_6 : f32 to vector<2x8x8xf32>
    %28 = arith.select %26, %23, %27 : vector<2x8x8xi1>, vector<2x8x8xf32>
    %cst_7 = arith.constant dense<0xFF800000> : vector<2x8xf32>
    %29 = vector.multi_reduction <maximumf>, %28, %cst_7 [2] : vector<2x8x8xf32> to vector<2x8xf32>
    %30 = vector.shape_cast %29 : vector<2x8xf32> to vector<2x8x1xf32>
    %31 = vector.broadcast %30 : vector<2x8x1xf32> to vector<2x8x8xf32>
    %32 = arith.subf %28, %31 : vector<2x8x8xf32>
    %33 = math.exp %32 : vector<2x8x8xf32>
    %cst_8 = arith.constant dense<0.000000e+00> : vector<2x8xf32>
    %34 = vector.multi_reduction <add>, %33, %cst_8 [2] : vector<2x8x8xf32> to vector<2x8xf32>
    %35 = vector.shape_cast %34 : vector<2x8xf32> to vector<2x8x1xf32>
    %36 = tpu.reciprocal %35 {approx = true} : vector<2x8x1xf32> -> vector<2x8x1xf32>
    %37 = vector.broadcast %36 : vector<2x8x1xf32> to vector<2x8x8xf32>
    %38 = arith.mulf %33, %37 : vector<2x8x8xf32>
    %39 = arith.truncf %38 : vector<2x8x8xf32> to vector<2x8x8xbf16>
    "tpu.trace_start"() <{level = 10 : i32, message = "bts,bsd->btd"}> : () -> ()
    %cst_9 = arith.constant dense<0.000000e+00> : vector<2x8x64xf32>
    %40 = tpu.matmul %39, %20, %cst_9 {dimension_numbers = #tpu.dot_dimension_numbers<[2], [1], [1], [2], [0, 0, 0, 1, 1, 2], [0], [0]>} : vector<2x8x8xbf16>, vector<2x8x64xbf16>, vector<2x8x64xf32> -> vector<2x8x64xf32>
    "tpu.trace_stop"() : () -> ()
    %41 = vector.shape_cast %40 : vector<2x8x64xf32> to vector<16x64xf32>
    %42 = vector.extract_strided_slice %4 {offsets = [0, 64], sizes = [16, 64], strides = [1, 1]} : vector<16x384xbf16> to vector<16x64xbf16>
    %43 = vector.shape_cast %42 : vector<16x64xbf16> to vector<2x8x64xbf16>
    %44 = vector.extract_strided_slice %6 {offsets = [0, 64], sizes = [16, 64], strides = [1, 1]} : vector<16x384xbf16> to vector<16x64xbf16>
    %45 = vector.shape_cast %44 : vector<16x64xbf16> to vector<2x8x64xbf16>
    %46 = vector.extract_strided_slice %8 {offsets = [0, 64], sizes = [16, 64], strides = [1, 1]} : vector<16x384xbf16> to vector<16x64xbf16>
    %47 = vector.shape_cast %46 : vector<16x64xbf16> to vector<2x8x64xbf16>
    "tpu.trace_start"() <{level = 10 : i32, message = "btd,bsd->bts"}> : () -> ()
    %cst_10 = arith.constant dense<0.000000e+00> : vector<2x8x8xf32>
    %48 = tpu.matmul %43, %45, %cst_10 {dimension_numbers = #tpu.dot_dimension_numbers<[2], [2], [1], [1], [0, 0, 0, 1, 1, 1], [0], [0]>} : vector<2x8x64xbf16>, vector<2x8x64xbf16>, vector<2x8x8xf32> -> vector<2x8x8xf32>
    "tpu.trace_stop"() : () -> ()
    %cst_11 = arith.constant 1.250000e-01 : f32
    %49 = vector.broadcast %cst_11 : f32 to vector<2x8x8xf32>
    %50 = arith.mulf %48, %49 : vector<2x8x8xf32>
    %cst_12 = arith.constant 0.000000e+00 : f32
    %51 = vector.broadcast %cst_12 : f32 to vector<2x8x8xf32>
    %52 = arith.cmpf one, %50, %51 : vector<2x8x8xf32>
    %53 = arith.andi %14, %52 : vector<2x8x8xi1>
    %cst_13 = arith.constant 0xFF800000 : f32
    %54 = vector.broadcast %cst_13 : f32 to vector<2x8x8xf32>
    %55 = arith.select %53, %50, %54 : vector<2x8x8xi1>, vector<2x8x8xf32>
    %cst_14 = arith.constant dense<0xFF800000> : vector<2x8xf32>
    %56 = vector.multi_reduction <maximumf>, %55, %cst_14 [2] : vector<2x8x8xf32> to vector<2x8xf32>
    %57 = vector.shape_cast %56 : vector<2x8xf32> to vector<2x8x1xf32>
    %58 = vector.broadcast %57 : vector<2x8x1xf32> to vector<2x8x8xf32>
    %59 = arith.subf %55, %58 : vector<2x8x8xf32>
    %60 = math.exp %59 : vector<2x8x8xf32>
    %cst_15 = arith.constant dense<0.000000e+00> : vector<2x8xf32>
    %61 = vector.multi_reduction <add>, %60, %cst_15 [2] : vector<2x8x8xf32> to vector<2x8xf32>
    %62 = vector.shape_cast %61 : vector<2x8xf32> to vector<2x8x1xf32>
    %63 = tpu.reciprocal %62 {approx = true} : vector<2x8x1xf32> -> vector<2x8x1xf32>
    %64 = vector.broadcast %63 : vector<2x8x1xf32> to vector<2x8x8xf32>
    %65 = arith.mulf %60, %64 : vector<2x8x8xf32>
    %66 = arith.truncf %65 : vector<2x8x8xf32> to vector<2x8x8xbf16>
    "tpu.trace_start"() <{level = 10 : i32, message = "bts,bsd->btd"}> : () -> ()
    %cst_16 = arith.constant dense<0.000000e+00> : vector<2x8x64xf32>
    %67 = tpu.matmul %66, %47, %cst_16 {dimension_numbers = #tpu.dot_dimension_numbers<[2], [1], [1], [2], [0, 0, 0, 1, 1, 2], [0], [0]>} : vector<2x8x8xbf16>, vector<2x8x64xbf16>, vector<2x8x64xf32> -> vector<2x8x64xf32>
    "tpu.trace_stop"() : () -> ()
    %68 = vector.shape_cast %67 : vector<2x8x64xf32> to vector<16x64xf32>
    %69 = vector.extract_strided_slice %4 {offsets = [0, 128], sizes = [16, 64], strides = [1, 1]} : vector<16x384xbf16> to vector<16x64xbf16>
    %70 = vector.shape_cast %69 : vector<16x64xbf16> to vector<2x8x64xbf16>
    %71 = vector.extract_strided_slice %6 {offsets = [0, 128], sizes = [16, 64], strides = [1, 1]} : vector<16x384xbf16> to vector<16x64xbf16>
    %72 = vector.shape_cast %71 : vector<16x64xbf16> to vector<2x8x64xbf16>
    %73 = vector.extract_strided_slice %8 {offsets = [0, 128], sizes = [16, 64], strides = [1, 1]} : vector<16x384xbf16> to vector<16x64xbf16>
    %74 = vector.shape_cast %73 : vector<16x64xbf16> to vector<2x8x64xbf16>
    "tpu.trace_start"() <{level = 10 : i32, message = "btd,bsd->bts"}> : () -> ()
    %cst_17 = arith.constant dense<0.000000e+00> : vector<2x8x8xf32>
    %75 = tpu.matmul %70, %72, %cst_17 {dimension_numbers = #tpu.dot_dimension_numbers<[2], [2], [1], [1], [0, 0, 0, 1, 1, 1], [0], [0]>} : vector<2x8x64xbf16>, vector<2x8x64xbf16>, vector<2x8x8xf32> -> vector<2x8x8xf32>
    "tpu.trace_stop"() : () -> ()
    %cst_18 = arith.constant 1.250000e-01 : f32
    %76 = vector.broadcast %cst_18 : f32 to vector<2x8x8xf32>
    %77 = arith.mulf %75, %76 : vector<2x8x8xf32>
    %cst_19 = arith.constant 0.000000e+00 : f32
    %78 = vector.broadcast %cst_19 : f32 to vector<2x8x8xf32>
    %79 = arith.cmpf one, %77, %78 : vector<2x8x8xf32>
    %80 = arith.andi %14, %79 : vector<2x8x8xi1>
    %cst_20 = arith.constant 0xFF800000 : f32
    %81 = vector.broadcast %cst_20 : f32 to vector<2x8x8xf32>
    %82 = arith.select %80, %77, %81 : vector<2x8x8xi1>, vector<2x8x8xf32>
    %cst_21 = arith.constant dense<0xFF800000> : vector<2x8xf32>
    %83 = vector.multi_reduction <maximumf>, %82, %cst_21 [2] : vector<2x8x8xf32> to vector<2x8xf32>
    %84 = vector.shape_cast %83 : vector<2x8xf32> to vector<2x8x1xf32>
    %85 = vector.broadcast %84 : vector<2x8x1xf32> to vector<2x8x8xf32>
    %86 = arith.subf %82, %85 : vector<2x8x8xf32>
    %87 = math.exp %86 : vector<2x8x8xf32>
    %cst_22 = arith.constant dense<0.000000e+00> : vector<2x8xf32>
    %88 = vector.multi_reduction <add>, %87, %cst_22 [2] : vector<2x8x8xf32> to vector<2x8xf32>
    %89 = vector.shape_cast %88 : vector<2x8xf32> to vector<2x8x1xf32>
    %90 = tpu.reciprocal %89 {approx = true} : vector<2x8x1xf32> -> vector<2x8x1xf32>
    %91 = vector.broadcast %90 : vector<2x8x1xf32> to vector<2x8x8xf32>
    %92 = arith.mulf %87, %91 : vector<2x8x8xf32>
    %93 = arith.truncf %92 : vector<2x8x8xf32> to vector<2x8x8xbf16>
    "tpu.trace_start"() <{level = 10 : i32, message = "bts,bsd->btd"}> : () -> ()
    %cst_23 = arith.constant dense<0.000000e+00> : vector<2x8x64xf32>
    %94 = tpu.matmul %93, %74, %cst_23 {dimension_numbers = #tpu.dot_dimension_numbers<[2], [1], [1], [2], [0, 0, 0, 1, 1, 2], [0], [0]>} : vector<2x8x8xbf16>, vector<2x8x64xbf16>, vector<2x8x64xf32> -> vector<2x8x64xf32>
    "tpu.trace_stop"() : () -> ()
    %95 = vector.shape_cast %94 : vector<2x8x64xf32> to vector<16x64xf32>
    %96 = vector.extract_strided_slice %4 {offsets = [0, 192], sizes = [16, 64], strides = [1, 1]} : vector<16x384xbf16> to vector<16x64xbf16>
    %97 = vector.shape_cast %96 : vector<16x64xbf16> to vector<2x8x64xbf16>
    %98 = vector.extract_strided_slice %6 {offsets = [0, 192], sizes = [16, 64], strides = [1, 1]} : vector<16x384xbf16> to vector<16x64xbf16>
    %99 = vector.shape_cast %98 : vector<16x64xbf16> to vector<2x8x64xbf16>
    %100 = vector.extract_strided_slice %8 {offsets = [0, 192], sizes = [16, 64], strides = [1, 1]} : vector<16x384xbf16> to vector<16x64xbf16>
    %101 = vector.shape_cast %100 : vector<16x64xbf16> to vector<2x8x64xbf16>
    "tpu.trace_start"() <{level = 10 : i32, message = "btd,bsd->bts"}> : () -> ()
    %cst_24 = arith.constant dense<0.000000e+00> : vector<2x8x8xf32>
    %102 = tpu.matmul %97, %99, %cst_24 {dimension_numbers = #tpu.dot_dimension_numbers<[2], [2], [1], [1], [0, 0, 0, 1, 1, 1], [0], [0]>} : vector<2x8x64xbf16>, vector<2x8x64xbf16>, vector<2x8x8xf32> -> vector<2x8x8xf32>
    "tpu.trace_stop"() : () -> ()
    %cst_25 = arith.constant 1.250000e-01 : f32
    %103 = vector.broadcast %cst_25 : f32 to vector<2x8x8xf32>
    %104 = arith.mulf %102, %103 : vector<2x8x8xf32>
    %cst_26 = arith.constant 0.000000e+00 : f32
    %105 = vector.broadcast %cst_26 : f32 to vector<2x8x8xf32>
    %106 = arith.cmpf one, %104, %105 : vector<2x8x8xf32>
    %107 = arith.andi %14, %106 : vector<2x8x8xi1>
    %cst_27 = arith.constant 0xFF800000 : f32
    %108 = vector.broadcast %cst_27 : f32 to vector<2x8x8xf32>
    %109 = arith.select %107, %104, %108 : vector<2x8x8xi1>, vector<2x8x8xf32>
    %cst_28 = arith.constant dense<0xFF800000> : vector<2x8xf32>
    %110 = vector.multi_reduction <maximumf>, %109, %cst_28 [2] : vector<2x8x8xf32> to vector<2x8xf32>
    %111 = vector.shape_cast %110 : vector<2x8xf32> to vector<2x8x1xf32>
    %112 = vector.broadcast %111 : vector<2x8x1xf32> to vector<2x8x8xf32>
    %113 = arith.subf %109, %112 : vector<2x8x8xf32>
    %114 = math.exp %113 : vector<2x8x8xf32>
    %cst_29 = arith.constant dense<0.000000e+00> : vector<2x8xf32>
    %115 = vector.multi_reduction <add>, %114, %cst_29 [2] : vector<2x8x8xf32> to vector<2x8xf32>
    %116 = vector.shape_cast %115 : vector<2x8xf32> to vector<2x8x1xf32>
    %117 = tpu.reciprocal %116 {approx = true} : vector<2x8x1xf32> -> vector<2x8x1xf32>
    %118 = vector.broadcast %117 : vector<2x8x1xf32> to vector<2x8x8xf32>
    %119 = arith.mulf %114, %118 : vector<2x8x8xf32>
    %120 = arith.truncf %119 : vector<2x8x8xf32> to vector<2x8x8xbf16>
    "tpu.trace_start"() <{level = 10 : i32, message = "bts,bsd->btd"}> : () -> ()
    %cst_30 = arith.constant dense<0.000000e+00> : vector<2x8x64xf32>
    %121 = tpu.matmul %120, %101, %cst_30 {dimension_numbers = #tpu.dot_dimension_numbers<[2], [1], [1], [2], [0, 0, 0, 1, 1, 2], [0], [0]>} : vector<2x8x8xbf16>, vector<2x8x64xbf16>, vector<2x8x64xf32> -> vector<2x8x64xf32>
    "tpu.trace_stop"() : () -> ()
    %122 = vector.shape_cast %121 : vector<2x8x64xf32> to vector<16x64xf32>
    %123 = vector.extract_strided_slice %4 {offsets = [0, 256], sizes = [16, 64], strides = [1, 1]} : vector<16x384xbf16> to vector<16x64xbf16>
    %124 = vector.shape_cast %123 : vector<16x64xbf16> to vector<2x8x64xbf16>
    %125 = vector.extract_strided_slice %6 {offsets = [0, 256], sizes = [16, 64], strides = [1, 1]} : vector<16x384xbf16> to vector<16x64xbf16>
    %126 = vector.shape_cast %125 : vector<16x64xbf16> to vector<2x8x64xbf16>
    %127 = vector.extract_strided_slice %8 {offsets = [0, 256], sizes = [16, 64], strides = [1, 1]} : vector<16x384xbf16> to vector<16x64xbf16>
    %128 = vector.shape_cast %127 : vector<16x64xbf16> to vector<2x8x64xbf16>
    "tpu.trace_start"() <{level = 10 : i32, message = "btd,bsd->bts"}> : () -> ()
    %cst_31 = arith.constant dense<0.000000e+00> : vector<2x8x8xf32>
    %129 = tpu.matmul %124, %126, %cst_31 {dimension_numbers = #tpu.dot_dimension_numbers<[2], [2], [1], [1], [0, 0, 0, 1, 1, 1], [0], [0]>} : vector<2x8x64xbf16>, vector<2x8x64xbf16>, vector<2x8x8xf32> -> vector<2x8x8xf32>
    "tpu.trace_stop"() : () -> ()
    %cst_32 = arith.constant 1.250000e-01 : f32
    %130 = vector.broadcast %cst_32 : f32 to vector<2x8x8xf32>
    %131 = arith.mulf %129, %130 : vector<2x8x8xf32>
    %cst_33 = arith.constant 0.000000e+00 : f32
    %132 = vector.broadcast %cst_33 : f32 to vector<2x8x8xf32>
    %133 = arith.cmpf one, %131, %132 : vector<2x8x8xf32>
    %134 = arith.andi %14, %133 : vector<2x8x8xi1>
    %cst_34 = arith.constant 0xFF800000 : f32
    %135 = vector.broadcast %cst_34 : f32 to vector<2x8x8xf32>
    %136 = arith.select %134, %131, %135 : vector<2x8x8xi1>, vector<2x8x8xf32>
    %cst_35 = arith.constant dense<0xFF800000> : vector<2x8xf32>
    %137 = vector.multi_reduction <maximumf>, %136, %cst_35 [2] : vector<2x8x8xf32> to vector<2x8xf32>
    %138 = vector.shape_cast %137 : vector<2x8xf32> to vector<2x8x1xf32>
    %139 = vector.broadcast %138 : vector<2x8x1xf32> to vector<2x8x8xf32>
    %140 = arith.subf %136, %139 : vector<2x8x8xf32>
    %141 = math.exp %140 : vector<2x8x8xf32>
    %cst_36 = arith.constant dense<0.000000e+00> : vector<2x8xf32>
    %142 = vector.multi_reduction <add>, %141, %cst_36 [2] : vector<2x8x8xf32> to vector<2x8xf32>
    %143 = vector.shape_cast %142 : vector<2x8xf32> to vector<2x8x1xf32>
    %144 = tpu.reciprocal %143 {approx = true} : vector<2x8x1xf32> -> vector<2x8x1xf32>
    %145 = vector.broadcast %144 : vector<2x8x1xf32> to vector<2x8x8xf32>
    %146 = arith.mulf %141, %145 : vector<2x8x8xf32>
    %147 = arith.truncf %146 : vector<2x8x8xf32> to vector<2x8x8xbf16>
    "tpu.trace_start"() <{level = 10 : i32, message = "bts,bsd->btd"}> : () -> ()
    %cst_37 = arith.constant dense<0.000000e+00> : vector<2x8x64xf32>
    %148 = tpu.matmul %147, %128, %cst_37 {dimension_numbers = #tpu.dot_dimension_numbers<[2], [1], [1], [2], [0, 0, 0, 1, 1, 2], [0], [0]>} : vector<2x8x8xbf16>, vector<2x8x64xbf16>, vector<2x8x64xf32> -> vector<2x8x64xf32>
    "tpu.trace_stop"() : () -> ()
    %149 = vector.shape_cast %148 : vector<2x8x64xf32> to vector<16x64xf32>
    %150 = vector.extract_strided_slice %4 {offsets = [0, 320], sizes = [16, 64], strides = [1, 1]} : vector<16x384xbf16> to vector<16x64xbf16>
    %151 = vector.shape_cast %150 : vector<16x64xbf16> to vector<2x8x64xbf16>
    %152 = vector.extract_strided_slice %6 {offsets = [0, 320], sizes = [16, 64], strides = [1, 1]} : vector<16x384xbf16> to vector<16x64xbf16>
    %153 = vector.shape_cast %152 : vector<16x64xbf16> to vector<2x8x64xbf16>
    %154 = vector.extract_strided_slice %8 {offsets = [0, 320], sizes = [16, 64], strides = [1, 1]} : vector<16x384xbf16> to vector<16x64xbf16>
    %155 = vector.shape_cast %154 : vector<16x64xbf16> to vector<2x8x64xbf16>
    "tpu.trace_start"() <{level = 10 : i32, message = "btd,bsd->bts"}> : () -> ()
    %cst_38 = arith.constant dense<0.000000e+00> : vector<2x8x8xf32>
    %156 = tpu.matmul %151, %153, %cst_38 {dimension_numbers = #tpu.dot_dimension_numbers<[2], [2], [1], [1], [0, 0, 0, 1, 1, 1], [0], [0]>} : vector<2x8x64xbf16>, vector<2x8x64xbf16>, vector<2x8x8xf32> -> vector<2x8x8xf32>
    "tpu.trace_stop"() : () -> ()
    %cst_39 = arith.constant 1.250000e-01 : f32
    %157 = vector.broadcast %cst_39 : f32 to vector<2x8x8xf32>
    %158 = arith.mulf %156, %157 : vector<2x8x8xf32>
    %cst_40 = arith.constant 0.000000e+00 : f32
    %159 = vector.broadcast %cst_40 : f32 to vector<2x8x8xf32>
    %160 = arith.cmpf one, %158, %159 : vector<2x8x8xf32>
    %161 = arith.andi %14, %160 : vector<2x8x8xi1>
    %cst_41 = arith.constant 0xFF800000 : f32
    %162 = vector.broadcast %cst_41 : f32 to vector<2x8x8xf32>
    %163 = arith.select %161, %158, %162 : vector<2x8x8xi1>, vector<2x8x8xf32>
    %cst_42 = arith.constant dense<0xFF800000> : vector<2x8xf32>
    %164 = vector.multi_reduction <maximumf>, %163, %cst_42 [2] : vector<2x8x8xf32> to vector<2x8xf32>
    %165 = vector.shape_cast %164 : vector<2x8xf32> to vector<2x8x1xf32>
    %166 = vector.broadcast %165 : vector<2x8x1xf32> to vector<2x8x8xf32>
    %167 = arith.subf %163, %166 : vector<2x8x8xf32>
    %168 = math.exp %167 : vector<2x8x8xf32>
    %cst_43 = arith.constant dense<0.000000e+00> : vector<2x8xf32>
    %169 = vector.multi_reduction <add>, %168, %cst_43 [2] : vector<2x8x8xf32> to vector<2x8xf32>
    %170 = vector.shape_cast %169 : vector<2x8xf32> to vector<2x8x1xf32>
    %171 = tpu.reciprocal %170 {approx = true} : vector<2x8x1xf32> -> vector<2x8x1xf32>
    %172 = vector.broadcast %171 : vector<2x8x1xf32> to vector<2x8x8xf32>
    %173 = arith.mulf %168, %172 : vector<2x8x8xf32>
    %174 = arith.truncf %173 : vector<2x8x8xf32> to vector<2x8x8xbf16>
    "tpu.trace_start"() <{level = 10 : i32, message = "bts,bsd->btd"}> : () -> ()
    %cst_44 = arith.constant dense<0.000000e+00> : vector<2x8x64xf32>
    %175 = tpu.matmul %174, %155, %cst_44 {dimension_numbers = #tpu.dot_dimension_numbers<[2], [1], [1], [2], [0, 0, 0, 1, 1, 2], [0], [0]>} : vector<2x8x8xbf16>, vector<2x8x64xbf16>, vector<2x8x64xf32> -> vector<2x8x64xf32>
    "tpu.trace_stop"() : () -> ()
    %176 = vector.shape_cast %175 : vector<2x8x64xf32> to vector<16x64xf32>
    %177 = tpu.concatenate %41, %68, %95, %122, %149, %176 in 1 : vector<16x64xf32>, vector<16x64xf32>, vector<16x64xf32>, vector<16x64xf32>, vector<16x64xf32>, vector<16x64xf32> -> vector<16x384xf32>
    %178 = arith.truncf %177 : vector<16x384xf32> to vector<16x384xbf16>
    %c0_45 = arith.constant 0 : index
    %c0_46 = arith.constant 0 : index
    %179 = vector.load %arg2[%c0_45, %c0_46] : memref<384x384xbf16, #tpu.memory_space<vmem>>, vector<384x384xbf16>
    %cst_47 = arith.constant dense<0.000000e+00> : vector<16x384xf32>
    %180 = tpu.matmul %178, %179, %cst_47 {dimension_numbers = #tpu.dot_dimension_numbers<[1], [0], [0], [1], [0, 0, 1, 1], [], []>} : vector<16x384xbf16>, vector<384x384xbf16>, vector<16x384xf32> -> vector<16x384xf32>
    %c0_48 = arith.constant 0 : index
    %c0_49 = arith.constant 0 : index
    %181 = vector.load %arg3[%c0_48, %c0_49] : memref<1x384xf32, #tpu.memory_space<vmem>>, vector<1x384xf32>
    %182 = vector.broadcast %181 : vector<1x384xf32> to vector<16x384xf32>
    %183 = arith.addf %180, %182 : vector<16x384xf32>
    %c0_50 = arith.constant 0 : index
    %c0_51 = arith.constant 0 : index
    %184 = vector.load %arg4[%c0_50, %c0_51] : memref<16x384xf32, #tpu.memory_space<vmem>>, vector<16x384xf32>
    tpu.vector_store %arg4[%c0_50, %c0_51], %183 {strides = array<i32>} : memref<16x384xf32, #tpu.memory_space<vmem>>, vector<16x384xf32>,
    return
  }
}

</mosaic_0001>

<bundles_post_ra>
// kernel: forward.1
= control target key start
LH: loop header
LB: loop body
LE: loop exit
PB: predicated region body
PF: predicated region fallthrough
CT: control target
= control target key end

     0   :  { %9 = vsyncpa [#allocation3], 0  ;;  %s5617_s0 = inlined_call_operand.vmem [shape: bf16[16,384], index: 0, kind: input, shape index: {}]   ;;  %s5618_s1 = inlined_call_operand.hbm [shape: bf16[384,1152], index: 1, kind: input, shape index: {}]   ;;  %s5619_s2 = inlined_call_operand.hbm [shape: bf16[384,384], index: 2, kind: input, shape index: {}]   ;;  %s5620_s3 = inlined_call_operand.vmem [shape: f32[1,384], index: 3, kind: input, shape index: {}]   ;;  %s5621_s4 = inlined_call_operand.hbm [shape: f32[16,384], index: 4, kind: output, shape index: {}]  }
   0x1   :  { %10 = vsyncpa [#allocation6], 0 }
   0x2   :  { %11 = vsyncpa [#allocation4], 0  ;;  %s5157_s15 = smov [#allocation2]  }
   0x3   :  { %s19_s16 = sshll.u32 %s5157_s15, 4  ;;  %s20_s16 = int_to_ptr.vmem [resolvable:$true] %s19_s16 }
   0x4   :  { %s5099_s17 = scalar_lea.vmem %s20_s16, 27648  ;;  %p5104_p1 = scmp.lt.s32.totalorder %s20_s16, %s20_s16 }
   0x5   :  { %p5100_p0 = scmp.ne.s32.totalorder %s20_s16, %s5099_s17  ;;  %p5105_p2 = scmp.lt.s32.totalorder %s5099_s17, %s5099_s17 }
   0x7   :  { %p5106_p3 = por %p5105_p2, %p5104_p1 }
   0x9   :  { %p5107_p4 = pnand %p5106_p3, %p5100_p0 }
   0xb   :  { %5110 = shalt.err (!%p5107_p4)
}
   0xc   :  { %s5158_s18 = smov 576   ;;  %s5159_s19 = smov 36  }
   0xd   :  { %25 = dma.hbm_to_vmem [thread:$0]  %s5618_s1, 27648, %s20_s16, [#allocation3], %s5158_s18, %s5158_s18, %s5159_s19  }
   0xe   :  { %s5160_s22 = smov [#allocation5]  }
   0xf   :  { %s31_s23 = sshll.u32 %s5160_s22, 4  ;;  %s32_s23 = int_to_ptr.vmem [resolvable:$true] %s31_s23 }
  0x10   :  { %s5119_s24 = scalar_lea.vmem %s32_s23, 9216  ;;  %p5124_p6 = scmp.lt.s32.totalorder %s32_s23, %s32_s23 }
  0x11   :  { %p5120_p5 = scmp.ne.s32.totalorder %s32_s23, %s5119_s24  ;;  %p5125_p7 = scmp.lt.s32.totalorder %s5119_s24, %s5119_s24 }
  0x13   :  { %p5126_p8 = por %p5125_p7, %p5124_p6 }
  0x15   :  { %p5127_p9 = pnand %p5126_p8, %p5120_p5 }
  0x17   :  { %5130 = shalt.err (!%p5127_p9)
}
  0x18   :  { %s5161_s25 = smov 192   ;;  %s5162_s26 = smov 12  }
  0x19   :  { %37 = dma.hbm_to_vmem [thread:$0]  %s5619_s2, 9216, %s32_s23, [#allocation6], %s5161_s25, %s5161_s25, %s5162_s26  }
  0x1a   :  { %5151 = dma.done.wait [#allocation3], 27648  }
  0x1b   :  { %5152 = vsyncadd [#allocation3], 4294939648 }
  0x1c   :  { %5153 = dma.done.wait [#allocation6], 9216  }
  0x1d   :  { %5154 = vsyncadd [#allocation6], 4294958080  ;;  %v5163_v0 = vmov 0   ;;  %v4628_v1 = vld [vmem:[#allocation2 + $0x1fc] ss:$36 sps:$4 sm:$0xff]   ;;  %vm5165_vm0 = vmmov 0  }
  0x1e   :  { %1486 = vmatprep.mubr.bf16.mxu1 %v5163_v0  ;;  %v4630_v2 = vld [vmem:[#allocation2 + $0x67c] ss:$36 sps:$4 sm:$0xff]   ;;  %1411 = vmatprep.subr.bf16.mxu0 %v4628_v1  ;;  %v4634_v5 = vld [vmem:[#allocation2 + $0x1b4] ss:$36 sps:$4 sm:$0xff]   ;;  %v4640_v9 = vld [vmem:[#allocation2 + $0x16c] ss:$36 sps:$4 sm:$0xff]  }
  0x1f   :  { %v4632_v3 = vld [vmem:[#allocation2 + $0x1f8] ss:$36 sps:$4 sm:$0xff]   ;;  %1454 = vmatprep.subr.bf16.mxu1 %v4630_v2  ;;  %v4638_v7 = vld [vmem:[#allocation2 + $0x1b0] ss:$36 sps:$4 sm:$0xff]   ;;  %v4644_v11 = vld [vmem:[#allocation2 + $0x168] ss:$36 sps:$4 sm:$0xff]  }
  0x20   :  { %v4633_v4 = vld [vmem:[#allocation2 + $0x678] ss:$36 sps:$4 sm:$0xff]   ;;  %1412 = vmatpush1.bf16.msra.mxu0 %v4632_v3  ;;  %v4639_v8 = vld [vmem:[#allocation2 + $0x630] ss:$36 sps:$4 sm:$0xff]   ;;  %v4645_v12 = vld [vmem:[#allocation2 + $0x5e8] ss:$36 sps:$4 sm:$0xff]  }
  0x21   :  { %1455 = vmatpush1.bf16.msra.mxu1 %v4633_v4  ;;  %v4636_v6 = vld [vmem:[#allocation2 + $0x634] ss:$36 sps:$4 sm:$0xff]   ;;  %1413 = vmatprep.subr.bf16.mxu0 %v4634_v5  ;;  %v4642_v10 = vld [vmem:[#allocation2 + $0x5ec] ss:$36 sps:$4 sm:$0xff]   ;;  %v4646_v13 = vld [vmem:[#allocation2 + $0x124] ss:$36 sps:$4 sm:$0xff]  }
  0x22   :  { %1456 = vmatprep.subr.bf16.mxu1 %v4636_v6  ;;  %v4648_v14 = vld [vmem:[#allocation2 + $0x5a4] ss:$36 sps:$4 sm:$0xff]   ;;  %v4652_v17 = vld [vmem:[#allocation2 + $0xdc] ss:$36 sps:$4 sm:$0xff]   ;;  %v4658_v21 = vld [vmem:[#allocation2 + $0x94] ss:$36 sps:$4 sm:$0xff]  }
  0x23   :  { %v4650_v15 = vld [vmem:[#allocation2 + $0x120] ss:$36 sps:$4 sm:$0xff]   ;;  %v4656_v19 = vld [vmem:[#allocation2 + $0xd8] ss:$36 sps:$4 sm:$0xff]   ;;  %v4662_v23 = vld [vmem:[#allocation2 + $0x90] ss:$36 sps:$4 sm:$0xff]  }
  0x24   :  { %1414 = vmatpush1.bf16.msra.mxu0 %v4638_v7  ;;  %v4651_v16 = vld [vmem:[#allocation2 + $0x5a0] ss:$36 sps:$4 sm:$0xff]   ;;  %v4657_v20 = vld [vmem:[#allocation2 + $0x558] ss:$36 sps:$4 sm:$0xff]   ;;  %v4663_v24 = vld [vmem:[#allocation2 + $0x510] ss:$36 sps:$4 sm:$0xff]  }
  0x25   :  { %1457 = vmatpush1.bf16.msra.mxu1 %v4639_v8  ;;  %1415 = vmatprep.subr.bf16.mxu0 %v4640_v9  ;;  %v4654_v18 = vld [vmem:[#allocation2 + $0x55c] ss:$36 sps:$4 sm:$0xff]   ;;  %v4660_v22 = vld [vmem:[#allocation2 + $0x514] ss:$36 sps:$4 sm:$0xff]   ;;  %v4664_v25 = vld [vmem:[#allocation2 + $0x4c] ss:$36 sps:$4 sm:$0xff]  }
  0x26   :  { %1458 = vmatprep.subr.bf16.mxu1 %v4642_v10  ;;  %v4666_v26 = vld [vmem:[#allocation2 + $0x4cc] ss:$36 sps:$4 sm:$0xff]   ;;  %v4670_v29 = vld [vmem:[#allocation2 + $0x4] ss:$36 sps:$4 sm:$0xff]   ;;  %v4676_v33 = vld [vmem:[#allocation2 + $0x43c] ss:$36 sps:$4 sm:$0xff]  }
  0x27   :  { %v4668_v27 = vld [vmem:[#allocation2 + $0x48] ss:$36 sps:$4 sm:$0xff]   ;;  %v4674_v31 = vld [vmem:[#allocation2] ss:$36 sps:$4 sm:$0xff]   ;;  %v4682_v37 = vld [vmem:[#allocation2 + $0x438] ss:$36 sps:$4 sm:$0xff]  }
  0x28   :  { %1416 = vmatpush1.bf16.msra.mxu0 %v4644_v11  ;;  %v4669_v28 = vld [vmem:[#allocation2 + $0x4c8] ss:$36 sps:$4 sm:$0xff]   ;;  %v4675_v32 = vld [vmem:[#allocation2 + $0x480] ss:$36 sps:$4 sm:$0xff]   ;;  %v4683_v38 = vld [vmem:[#allocation2 + $0x3f4] ss:$36 sps:$4 sm:$0xff]  }
  0x29   :  { %1459 = vmatpush1.bf16.msra.mxu1 %v4645_v12  ;;  %1417 = vmatprep.subr.bf16.mxu0 %v4646_v13  ;;  %v4672_v30 = vld [vmem:[#allocation2 + $0x484] ss:$36 sps:$4 sm:$0xff]   ;;  %v4687_v39 = vld [vmem:[#allocation2 + $0x1bc] ss:$36 sps:$4 sm:$0xff]   ;;  %v4688_v41 = vld [vmem:[#allocation2 + $0x3f0] ss:$36 sps:$4 sm:$0xff]  }
  0x2a   :  { %1460 = vmatprep.subr.bf16.mxu1 %v4648_v14  ;;  %v4681_v34 = vld [vmem:[#allocation2 + $0x204] ss:$36 sps:$4 sm:$0xff]   ;;  %v4685_v40 = vld [vmem:[#allocation2 + $0x1b8] ss:$36 sps:$4 sm:$0xff]   ;;  %v4689_v42 = vld [vmem:[#allocation2 + $0x3ac] ss:$36 sps:$4 sm:$0xff]  }
  0x2b   :  { %v5205_v35 = vld [vmem:[%s5617_s0 + $0x8] ss:$12 sps:$4 sm:$0xff]   ;;  %v4679_v36 = vld [vmem:[#allocation2 + $0x200] ss:$36 sps:$4 sm:$0xff]   ;;  %v4699_v47 = vld [vmem:[#allocation2 + $0x12c] ss:$36 sps:$4 sm:$0xff]  }
  0x2c   :  { %1418 = vmatpush1.bf16.msra.mxu0 %v4650_v15  ;;  %v4693_v43 = vld [vmem:[#allocation2 + $0x174] ss:$36 sps:$4 sm:$0xff]   ;;  %v4694_v45 = vld [vmem:[#allocation2 + $0x3a8] ss:$36 sps:$4 sm:$0xff]   ;;  %v4700_v49 = vld [vmem:[#allocation2 + $0x360] ss:$36 sps:$4 sm:$0xff]  }
  0x2d   :  { %1461 = vmatpush1.bf16.msra.mxu1 %v4651_v16  ;;  %1419 = vmatprep.subr.bf16.mxu0 %v4652_v17  ;;  %v4691_v44 = vld [vmem:[#allocation2 + $0x170] ss:$36 sps:$4 sm:$0xff]   ;;  %v4695_v46 = vld [vmem:[#allocation2 + $0x364] ss:$36 sps:$4 sm:$0xff]   ;;  %v4701_v50 = vld [vmem:[#allocation2 + $0x31c] ss:$36 sps:$4 sm:$0xff]  }
  0x2e   :  { %1462 = vmatprep.subr.bf16.mxu1 %v4654_v18  ;;  %v4697_v48 = vld [vmem:[#allocation2 + $0x128] ss:$36 sps:$4 sm:$0xff]   ;;  %v5211_v51 = vld [vmem:[%s5617_s0 + $0x4] ss:$12 sps:$4 sm:$0xff]   ;;  %v4706_v54 = vld [vmem:[#allocation2 + $0x318] ss:$36 sps:$4 sm:$0xff]  }
  0x2f   :  { %v4705_v52 = vld [vmem:[#allocation2 + $0xe4] ss:$36 sps:$4 sm:$0xff]   ;;  %1443 = vmatprep.mubr.bf16.mxu0 %v5211_v51  ;;  %v4707_v55 = vld [vmem:[#allocation2 + $0x2d4] ss:$36 sps:$4 sm:$0xff]   ;;  %v4711_v56 = vld [vmem:[#allocation2 + $0x9c] ss:$36 sps:$4 sm:$0xff]  }
  0x30   :  { %1420 = vmatpush1.bf16.msra.mxu0 %v4656_v19  ;;  %v4703_v53 = vld [vmem:[#allocation2 + $0xe0] ss:$36 sps:$4 sm:$0xff]   ;;  %v4709_v57 = vld [vmem:[#allocation2 + $0x98] ss:$36 sps:$4 sm:$0xff]   ;;  %v4712_v58 = vld [vmem:[#allocation2 + $0x2d0] ss:$36 sps:$4 sm:$0xff]  }
  0x31   :  { %1463 = vmatpush1.bf16.msra.mxu1 %v4657_v20  ;;  %1421 = vmatprep.subr.bf16.mxu0 %v4658_v21  ;;  %v4713_v59 = vld [vmem:[#allocation2 + $0x28c] ss:$36 sps:$4 sm:$0xff]   ;;  %v4717_v60 = vld [vmem:[#allocation2 + $0x54] ss:$36 sps:$4 sm:$0xff]   ;;  %v4719_v63 = vld [vmem:[#allocation2 + $0x244] ss:$36 sps:$4 sm:$0xff]  }
  0x32   :  { %1464 = vmatprep.subr.bf16.mxu1 %v4660_v22  ;;  %v4715_v61 = vld [vmem:[#allocation2 + $0x50] ss:$36 sps:$4 sm:$0xff]   ;;  %v4718_v62 = vld [vmem:[#allocation2 + $0x288] ss:$36 sps:$4 sm:$0xff]   ;;  %v4724_v3 = vld [vmem:[#allocation2 + $0x240] ss:$36 sps:$4 sm:$0xff]  }
  0x33   :  { %v4723_v1 = vld [vmem:[#allocation2 + $0xc] ss:$36 sps:$4 sm:$0xff]   ;;  %v4730_v4 = vld [vmem:[#allocation2 + $0x444] ss:$36 sps:$4 sm:$0xff]   ;;  %v4736_v9 = vld [vmem:[#allocation2 + $0x3fc] ss:$36 sps:$4 sm:$0xff]  }
  0x34   :  { %1422 = vmatpush1.bf16.msra.mxu0 %v4662_v23  ;;  %v4721_v2 = vld [vmem:[#allocation2 + $0x8] ss:$36 sps:$4 sm:$0xff]   ;;  %v4728_v7 = vld [vmem:[#allocation2 + $0x440] ss:$36 sps:$4 sm:$0xff]   ;;  %v4734_v11 = vld [vmem:[#allocation2 + $0x3f8] ss:$36 sps:$4 sm:$0xff]  }
  0x35   :  { %1465 = vmatpush1.bf16.msra.mxu1 %v4663_v24  ;;  %1423 = vmatprep.subr.bf16.mxu0 %v4664_v25  ;;  %v4733_v5 = vld [vmem:[#allocation2 + $0x684] ss:$36 sps:$4 sm:$0xff]   ;;  %v5218_v6 = vld [vmem:[%s5617_s0] ss:$12 sps:$4 sm:$0xff]   ;;  %v4737_v12 = vld [vmem:[#allocation2 + $0x638] ss:$36 sps:$4 sm:$0xff]  }
  0x36   :  { %1466 = vmatprep.subr.bf16.mxu1 %v4666_v26  ;;  %v4731_v8 = vld [vmem:[#allocation2 + $0x680] ss:$36 sps:$4 sm:$0xff]   ;;  %v4742_v13 = vld [vmem:[#allocation2 + $0x3b4] ss:$36 sps:$4 sm:$0xff]   ;;  %v4748_v17 = vld [vmem:[#allocation2 + $0x36c] ss:$36 sps:$4 sm:$0xff]  }
  0x37   :  { %v4739_v10 = vld [vmem:[#allocation2 + $0x63c] ss:$36 sps:$4 sm:$0xff]   ;;  %v4745_v14 = vld [vmem:[#allocation2 + $0x5f4] ss:$36 sps:$4 sm:$0xff]   ;;  %v4751_v18 = vld [vmem:[#allocation2 + $0x5ac] ss:$36 sps:$4 sm:$0xff]  }
  0x38   :  { %1424 = vmatpush1.bf16.msra.mxu0 %v4668_v27  ;;  %v4740_v15 = vld [vmem:[#allocation2 + $0x3b0] ss:$36 sps:$4 sm:$0xff]   ;;  %v4746_v19 = vld [vmem:[#allocation2 + $0x368] ss:$36 sps:$4 sm:$0xff]   ;;  %v4752_v23 = vld [vmem:[#allocation2 + $0x320] ss:$36 sps:$4 sm:$0xff]  }
  0x39   :  { %1467 = vmatpush1.bf16.msra.mxu1 %v4669_v28  ;;  %1425 = vmatprep.subr.bf16.mxu0 %v4670_v29  ;;  %v4743_v16 = vld [vmem:[#allocation2 + $0x5f0] ss:$36 sps:$4 sm:$0xff]   ;;  %v4749_v20 = vld [vmem:[#allocation2 + $0x5a8] ss:$36 sps:$4 sm:$0xff]   ;;  %v4755_v24 = vld [vmem:[#allocation2 + $0x560] ss:$36 sps:$4 sm:$0xff]  }
  0x3a   :  { %1468 = vmatprep.subr.bf16.mxu1 %v4672_v30  ;;  %v4754_v21 = vld [vmem:[#allocation2 + $0x324] ss:$36 sps:$4 sm:$0xff]   ;;  %v4760_v25 = vld [vmem:[#allocation2 + $0x2dc] ss:$36 sps:$4 sm:$0xff]   ;;  %v4766_v29 = vld [vmem:[#allocation2 + $0x294] ss:$36 sps:$4 sm:$0xff]  }
  0x3b   :  { %v4757_v22 = vld [vmem:[#allocation2 + $0x564] ss:$36 sps:$4 sm:$0xff]   ;;  %v4763_v26 = vld [vmem:[#allocation2 + $0x51c] ss:$36 sps:$4 sm:$0xff]   ;;  %v4769_v30 = vld [vmem:[#allocation2 + $0x4d4] ss:$36 sps:$4 sm:$0xff]  }
  0x3c   :  { %1426 = vmatpush1.bf16.msra.mxu0 %v4674_v31  ;;  %v4758_v27 = vld [vmem:[#allocation2 + $0x2d8] ss:$36 sps:$4 sm:$0xff]   ;;  %v4764_v31 = vld [vmem:[#allocation2 + $0x290] ss:$36 sps:$4 sm:$0xff]   ;;  %vm1868_vm1 = vcmask 523264   ;;  %vm1997_vm2 = vcmask 1043456  }
  0x3d   :  { %1469 = vmatpush1.bf16.msra.mxu1 %v4675_v32  ;;  %1427 = vmatprep.subr.bf16.mxu0 %v4676_v33  ;;  %v4761_v28 = vld [vmem:[#allocation2 + $0x518] ss:$36 sps:$4 sm:$0xff]   ;;  %v4767_v32 = vld [vmem:[#allocation2 + $0x4d0] ss:$36 sps:$4 sm:$0xff]   ;;  %vm1969_vm5 = vcmask 64512  }
  0x3e   :  { %1497 = vmatprep.subr.bf16.mxu1 %v4681_v34  ;;  %v4772_v33 = vld [vmem:[#allocation2 + $0x24c] ss:$36 sps:$4 sm:$0xff]  }
  0x3f   :  { %v4775_v34 = vld [vmem:[#allocation2 + $0x48c] ss:$36 sps:$4 sm:$0xff]  }
  0x40   :  { %1487 = vmatmul.mubr.bf16.vlgmr.msra.gmra.mxu1 %v5205_v35  ;;  %1428 = vmatpush2.bf16.msra.mxu0 %v4682_v37  ;;  %v4773_v37 = vld [vmem:[#allocation2 + $0x488] ss:$36 sps:$4 sm:$0xff]  }
  0x41   :  { %1498 = vmatpush1.bf16.msra.mxu1 %v4679_v36  ;;  %1429 = vmatprep.subr.bf16.mxu0 %v4683_v38  ;;  %v4770_v36 = vld [vmem:[#allocation2 + $0x248] ss:$36 sps:$4 sm:$0xff]  }
  0x42   :  { %1499 = vmatprep.subr.bf16.mxu1 %v4687_v39  ;;  %1529 = vmatprep.mubr.bf16.mxu1 %v5211_v51  ;;  %v4778_v38 = vld [vmem:[#allocation2 + $0x20c] ss:$36 sps:$4 sm:$0xff]  }
  0x43   :  { %v4805_v39 = vld [vmem:[#allocation2 + $0x68c] ss:$36 sps:$4 sm:$0xff]  }
  0x44   :  { %1430 = vmatpush2.bf16.msra.mxu0 %v4688_v41  ;;  %v4781_v41 = vld [vmem:[#allocation2 + $0x1c4] ss:$36 sps:$4 sm:$0xff]  }
  0x45   :  { %1500 = vmatpush1.bf16.msra.mxu1 %v4685_v40  ;;  %1431 = vmatprep.subr.bf16.mxu0 %v4689_v42  ;;  %v4776_v40 = vld [vmem:[#allocation2 + $0x208] ss:$36 sps:$4 sm:$0xff]  }
  0x46   :  { %1501 = vmatprep.subr.bf16.mxu1 %v4693_v43  ;;  %v4803_v42 = vld [vmem:[#allocation2 + $0x688] ss:$36 sps:$4 sm:$0xff]  }
  0x47   :  { %v4811_v43 = vld [vmem:[#allocation2 + $0x644] ss:$36 sps:$4 sm:$0xff]  }
  0x48   :  { %1432 = vmatpush2.bf16.msra.mxu0 %v4694_v45  ;;  %v4784_v45 = vld [vmem:[#allocation2 + $0x17c] ss:$36 sps:$4 sm:$0xff]  }
  0x49   :  { %1502 = vmatpush1.bf16.msra.mxu1 %v4691_v44  ;;  %1433 = vmatprep.subr.bf16.mxu0 %v4695_v46  ;;  %v4779_v44 = vld [vmem:[#allocation2 + $0x1c0] ss:$36 sps:$4 sm:$0xff]  }
  0x4a   :  { %1503 = vmatprep.subr.bf16.mxu1 %v4699_v47  ;;  %v4809_v46 = vld [vmem:[#allocation2 + $0x640] ss:$36 sps:$4 sm:$0xff]  }
  0x4b   :  { %v4817_v47 = vld [vmem:[#allocation2 + $0x5fc] ss:$36 sps:$4 sm:$0xff]  }
  0x4c   :  { %1434 = vmatpush2.bf16.msra.mxu0 %v4700_v49  ;;  %v4787_v49 = vld [vmem:[#allocation2 + $0x134] ss:$36 sps:$4 sm:$0xff]  }
  0x4d   :  { %1504 = vmatpush1.bf16.msra.mxu1 %v4697_v48  ;;  %1435 = vmatprep.subr.bf16.mxu0 %v4701_v50  ;;  %v4782_v48 = vld [vmem:[#allocation2 + $0x178] ss:$36 sps:$4 sm:$0xff]  }
  0x4e   :  { %1505 = vmatprep.subr.bf16.mxu1 %v4705_v52  ;;  %v4815_v50 = vld [vmem:[#allocation2 + $0x5f8] ss:$36 sps:$4 sm:$0xff]  }
  0x4f   :  { %v4823_v52 = vld [vmem:[#allocation2 + $0x5b4] ss:$36 sps:$4 sm:$0xff]  }
  0x50   :  { %1436 = vmatpush2.bf16.msra.mxu0 %v4706_v54  ;;  %v4790_v54 = vld [vmem:[#allocation2 + $0xec] ss:$36 sps:$4 sm:$0xff]  }
  0x51   :  { %1506 = vmatpush1.bf16.msra.mxu1 %v4703_v53  ;;  %1437 = vmatprep.subr.bf16.mxu0 %v4707_v55  ;;  %v4785_v53 = vld [vmem:[#allocation2 + $0x130] ss:$36 sps:$4 sm:$0xff]  }
  0x52   :  { %1507 = vmatprep.subr.bf16.mxu1 %v4711_v56  ;;  %v4821_v55 = vld [vmem:[#allocation2 + $0x5b0] ss:$36 sps:$4 sm:$0xff]  }
  0x53   :  { %v4829_v56 = vld [vmem:[#allocation2 + $0x56c] ss:$36 sps:$4 sm:$0xff]  }
  0x54   :  { %1438 = vmatpush2.bf16.msra.mxu0 %v4712_v58  ;;  %v4793_v58 = vld [vmem:[#allocation2 + $0xa4] ss:$36 sps:$4 sm:$0xff]  }
  0x55   :  { %1508 = vmatpush1.bf16.msra.mxu1 %v4709_v57  ;;  %1439 = vmatprep.subr.bf16.mxu0 %v4713_v59  ;;  %v4788_v57 = vld [vmem:[#allocation2 + $0xe8] ss:$36 sps:$4 sm:$0xff]  }
  0x56   :  { %1509 = vmatprep.subr.bf16.mxu1 %v4717_v60  ;;  %v4827_v59 = vld [vmem:[#allocation2 + $0x568] ss:$36 sps:$4 sm:$0xff]  }
  0x57   :  { %v4835_v60 = vld [vmem:[#allocation2 + $0x524] ss:$36 sps:$4 sm:$0xff]  }
  0x58   :  { %1440 = vmatpush2.bf16.msra.mxu0 %v4718_v62  ;;  %v4796_v62 = vld [vmem:[#allocation2 + $0x5c] ss:$36 sps:$4 sm:$0xff]  }
  0x59   :  { %1510 = vmatpush1.bf16.msra.mxu1 %v4715_v61  ;;  %1441 = vmatprep.subr.bf16.mxu0 %v4719_v63  ;;  %v4791_v61 = vld [vmem:[#allocation2 + $0xa0] ss:$36 sps:$4 sm:$0xff]  }
  0x5a   :  { %1511 = vmatprep.subr.bf16.mxu1 %v4723_v1  ;;  %v4833_v63 = vld [vmem:[#allocation2 + $0x520] ss:$36 sps:$4 sm:$0xff]  }
  0x5b   :  { %v4841_v1 = vld [vmem:[#allocation2 + $0x4dc] ss:$36 sps:$4 sm:$0xff]  }
  0x5c   :  { %1442 = vmatpush2.bf16.msra.mxu0 %v4724_v3  ;;  %v4799_v3 = vld [vmem:[#allocation2 + $0x14] ss:$36 sps:$4 sm:$0xff]  }
  0x5d   :  { %1512 = vmatpush1.bf16.msra.mxu1 %v4721_v2  ;;  %1540 = vmatprep.subr.bf16.mxu0 %v4733_v5  ;;  %v4794_v2 = vld [vmem:[#allocation2 + $0x58] ss:$36 sps:$4 sm:$0xff]  }
  0x5e   :  { %1513 = vmatprep.subr.bf16.mxu1 %v4730_v4  ;;  %v4839_v4 = vld [vmem:[#allocation2 + $0x4d8] ss:$36 sps:$4 sm:$0xff]  }
  0x5f   :  { %1444 = vmatmul.mubr.bf16.vlgmr.msra.gmra.mxu0 %v5218_v6  ;;  %v4847_v5 = vld [vmem:[#allocation2 + $0x494] ss:$36 sps:$4 sm:$0xff]  }
  0x60   :  { %1541 = vmatpush1.bf16.msra.mxu0 %v4731_v8  ;;  %1572 = vmatprep.mubr.bf16.mxu0 %v5163_v0  ;;  %v4802_v8 = vld [vmem:[#allocation2 + $0x44c] ss:$36 sps:$4 sm:$0xff]  }
  0x61   :  { %1514 = vmatpush2.bf16.msra.mxu1 %v4728_v7  ;;  %1542 = vmatprep.subr.bf16.mxu0 %v4739_v10  ;;  %v4797_v7 = vld [vmem:[#allocation2 + $0x10] ss:$36 sps:$4 sm:$0xff]  }
  0x62   :  { %1515 = vmatprep.subr.bf16.mxu1 %v4736_v9  ;;  %v4845_v9 = vld [vmem:[#allocation2 + $0x490] ss:$36 sps:$4 sm:$0xff]  }
  0x63   :  { %v4850_v10 = vld [vmem:[#allocation2 + $0x214] ss:$36 sps:$4 sm:$0xff]  }
  0x64   :  { %1543 = vmatpush1.bf16.msra.mxu0 %v4737_v12  ;;  %v4808_v12 = vld [vmem:[#allocation2 + $0x404] ss:$36 sps:$4 sm:$0xff]  }
  0x65   :  { %1516 = vmatpush2.bf16.msra.mxu1 %v4734_v11  ;;  %1544 = vmatprep.subr.bf16.mxu0 %v4745_v14  ;;  %v4800_v11 = vld [vmem:[#allocation2 + $0x448] ss:$36 sps:$4 sm:$0xff]  }
  0x66   :  { %1517 = vmatprep.subr.bf16.mxu1 %v4742_v13  ;;  %v4848_v13 = vld [vmem:[#allocation2 + $0x210] ss:$36 sps:$4 sm:$0xff]  }
  0x67   :  { %v4853_v14 = vld [vmem:[#allocation2 + $0x1cc] ss:$36 sps:$4 sm:$0xff]  }
  0x68   :  { %1545 = vmatpush1.bf16.msra.mxu0 %v4743_v16  ;;  %v4814_v16 = vld [vmem:[#allocation2 + $0x3bc] ss:$36 sps:$4 sm:$0xff]  }
  0x69   :  { %1518 = vmatpush2.bf16.msra.mxu1 %v4740_v15  ;;  %1546 = vmatprep.subr.bf16.mxu0 %v4751_v18  ;;  %v4806_v15 = vld [vmem:[#allocation2 + $0x400] ss:$36 sps:$4 sm:$0xff]  }
  0x6a   :  { %1519 = vmatprep.subr.bf16.mxu1 %v4748_v17  ;;  %v4851_v17 = vld [vmem:[#allocation2 + $0x1c8] ss:$36 sps:$4 sm:$0xff]  }
  0x6b   :  { %v4856_v18 = vld [vmem:[#allocation2 + $0x184] ss:$36 sps:$4 sm:$0xff]  }
  0x6c   :  { %1547 = vmatpush1.bf16.msra.mxu0 %v4749_v20  ;;  %v4820_v20 = vld [vmem:[#allocation2 + $0x374] ss:$36 sps:$4 sm:$0xff]  }
  0x6d   :  { %1520 = vmatpush2.bf16.msra.mxu1 %v4746_v19  ;;  %1548 = vmatprep.subr.bf16.mxu0 %v4757_v22  ;;  %v4812_v19 = vld [vmem:[#allocation2 + $0x3b8] ss:$36 sps:$4 sm:$0xff]  }
  0x6e   :  { %1521 = vmatprep.subr.bf16.mxu1 %v4754_v21  ;;  %v4854_v21 = vld [vmem:[#allocation2 + $0x180] ss:$36 sps:$4 sm:$0xff]  }
  0x6f   :  { %v4859_v22 = vld [vmem:[#allocation2 + $0x13c] ss:$36 sps:$4 sm:$0xff]  }
  0x70   :  { %1549 = vmatpush1.bf16.msra.mxu0 %v4755_v24  ;;  %v4826_v24 = vld [vmem:[#allocation2 + $0x32c] ss:$36 sps:$4 sm:$0xff]  }
  0x71   :  { %1522 = vmatpush2.bf16.msra.mxu1 %v4752_v23  ;;  %1550 = vmatprep.subr.bf16.mxu0 %v4763_v26  ;;  %v4818_v23 = vld [vmem:[#allocation2 + $0x370] ss:$36 sps:$4 sm:$0xff]   ;;  %v4824_v26 = vld [vmem:[#allocation2 + $0x328] ss:$36 sps:$4 sm:$0xff]  }
  0x72   :  { %1523 = vmatprep.subr.bf16.mxu1 %v4760_v25  ;;  %v4862_v25 = vld [vmem:[#allocation2 + $0xf4] ss:$36 sps:$4 sm:$0xff]  }
  0x74   :  { %1551 = vmatpush1.bf16.msra.mxu0 %v4761_v28  ;;  %v4865_v28 = vld [vmem:[#allocation2 + $0xac] ss:$36 sps:$4 sm:$0xff]  }
  0x75   :  { %1524 = vmatpush2.bf16.msra.mxu1 %v4758_v27  ;;  %1552 = vmatprep.subr.bf16.mxu0 %v4769_v30  ;;  %v4832_v27 = vld [vmem:[#allocation2 + $0x2e4] ss:$36 sps:$4 sm:$0xff]   ;;  %v4838_v30 = vld [vmem:[#allocation2 + $0x29c] ss:$36 sps:$4 sm:$0xff]  }
  0x76   :  { %1525 = vmatprep.subr.bf16.mxu1 %v4766_v29  ;;  %v4830_v29 = vld [vmem:[#allocation2 + $0x2e0] ss:$36 sps:$4 sm:$0xff]  }
  0x78   :  { %1553 = vmatpush1.bf16.msra.mxu0 %v4767_v32  ;;  %v4868_v32 = vld [vmem:[#allocation2 + $0x64] ss:$36 sps:$4 sm:$0xff]  }
  0x79   :  { %1526 = vmatpush2.bf16.msra.mxu1 %v4764_v31  ;;  %1554 = vmatprep.subr.bf16.mxu0 %v4775_v34  ;;  %v4863_v31 = vld [vmem:[#allocation2 + $0xa8] ss:$36 sps:$4 sm:$0xff]   ;;  %v4844_v34 = vld [vmem:[#allocation2 + $0x254] ss:$36 sps:$4 sm:$0xff]  }
  0x7a   :  { %1527 = vmatprep.subr.bf16.mxu1 %v4772_v33  ;;  %v4836_v33 = vld [vmem:[#allocation2 + $0x298] ss:$36 sps:$4 sm:$0xff]  }
  0x7c   :  { %1555 = vmatpush1.bf16.msra.mxu0 %v4773_v37  ;;  %v4871_v37 = vld [vmem:[#allocation2 + $0x1c] ss:$36 sps:$4 sm:$0xff]  }
  0x7d   :  { %1528 = vmatpush2.bf16.msra.mxu1 %v4770_v36  ;;  %1583 = vmatprep.subr.bf16.mxu0 %v4778_v38  ;;  %v4866_v36 = vld [vmem:[#allocation2 + $0x60] ss:$36 sps:$4 sm:$0xff]   ;;  %v4842_v38 = vld [vmem:[#allocation2 + $0x250] ss:$36 sps:$4 sm:$0xff]  }
  0x7e   :  { %1626 = vmatprep.subr.bf16.mxu1 %v4805_v39  ;;  %v4869_v39 = vld [vmem:[#allocation2 + $0x18] ss:$36 sps:$4 sm:$0xff]  }
  0x7f   :  { %1573 = vmatmul.mubr.bf16.vlgmr.msra.gmra.mxu0 %v5205_v35 }
  0x80   :  { %1530 = vmatmul.mubr.bf16.vlgmr.msra.gmra.mxu1 %v5218_v6  ;;  %1584 = vmatpush1.bf16.msra.mxu0 %v4776_v40  ;;  %v4874_v40 = vld [vmem:[#allocation2 + $0x694] ss:$36 sps:$4 sm:$0xff]  }
  0x81   :  { %1627 = vmatpush1.bf16.msra.mxu1 %v4803_v42  ;;  %1585 = vmatprep.subr.bf16.mxu0 %v4781_v41  ;;  %v4877_v41 = vld [vmem:[#allocation2 + $0x454] ss:$36 sps:$4 sm:$0xff]  }
  0x82   :  { %1628 = vmatprep.subr.bf16.mxu1 %v4811_v43  ;;  %1615 = vmatprep.mubr.bf16.mxu0 %v5211_v51  ;;  %v4872_v42 = vld [vmem:[#allocation2 + $0x690] ss:$36 sps:$4 sm:$0xff]  }
  0x83   :  { %1658 = vmatprep.mubr.bf16.mxu1 %v5163_v0  ;;  %v4875_v43 = vld [vmem:[#allocation2 + $0x450] ss:$36 sps:$4 sm:$0xff]  }
  0x84   :  { %1586 = vmatpush1.bf16.msra.mxu0 %v4779_v44  ;;  %v4880_v44 = vld [vmem:[#allocation2 + $0x64c] ss:$36 sps:$4 sm:$0xff]  }
  0x85   :  { %1629 = vmatpush1.bf16.msra.mxu1 %v4809_v46  ;;  %1587 = vmatprep.subr.bf16.mxu0 %v4784_v45  ;;  %v4883_v45 = vld [vmem:[#allocation2 + $0x40c] ss:$36 sps:$4 sm:$0xff]  }
  0x86   :  { %1630 = vmatprep.subr.bf16.mxu1 %v4817_v47  ;;  %v4878_v46 = vld [vmem:[#allocation2 + $0x648] ss:$36 sps:$4 sm:$0xff]  }
  0x87   :  { %v4881_v47 = vld [vmem:[#allocation2 + $0x408] ss:$36 sps:$4 sm:$0xff]  }
  0x88   :  { %1588 = vmatpush1.bf16.msra.mxu0 %v4782_v48  ;;  %v4886_v48 = vld [vmem:[#allocation2 + $0x604] ss:$36 sps:$4 sm:$0xff]  }
  0x89   :  { %1631 = vmatpush1.bf16.msra.mxu1 %v4815_v50  ;;  %1589 = vmatprep.subr.bf16.mxu0 %v4787_v49  ;;  %v4889_v49 = vld [vmem:[#allocation2 + $0x3c4] ss:$36 sps:$4 sm:$0xff]  }
  0x8a   :  { %1632 = vmatprep.subr.bf16.mxu1 %v4823_v52  ;;  %v4884_v50 = vld [vmem:[#allocation2 + $0x600] ss:$36 sps:$4 sm:$0xff]  }
  0x8b   :  { %v4887_v52 = vld [vmem:[#allocation2 + $0x3c0] ss:$36 sps:$4 sm:$0xff]  }
  0x8c   :  { %1590 = vmatpush1.bf16.msra.mxu0 %v4785_v53  ;;  %v4892_v53 = vld [vmem:[#allocation2 + $0x5bc] ss:$36 sps:$4 sm:$0xff]  }
  0x8d   :  { %1633 = vmatpush1.bf16.msra.mxu1 %v4821_v55  ;;  %1591 = vmatprep.subr.bf16.mxu0 %v4790_v54  ;;  %v4895_v54 = vld [vmem:[#allocation2 + $0x37c] ss:$36 sps:$4 sm:$0xff]  }
  0x8e   :  { %1634 = vmatprep.subr.bf16.mxu1 %v4829_v56  ;;  %v4890_v55 = vld [vmem:[#allocation2 + $0x5b8] ss:$36 sps:$4 sm:$0xff]  }
  0x8f   :  { %v4893_v56 = vld [vmem:[#allocation2 + $0x378] ss:$36 sps:$4 sm:$0xff]  }
  0x90   :  { %1592 = vmatpush1.bf16.msra.mxu0 %v4788_v57  ;;  %v4898_v57 = vld [vmem:[#allocation2 + $0x574] ss:$36 sps:$4 sm:$0xff]  }
  0x91   :  { %1635 = vmatpush1.bf16.msra.mxu1 %v4827_v59  ;;  %1593 = vmatprep.subr.bf16.mxu0 %v4793_v58  ;;  %v4896_v58 = vld [vmem:[#allocation2 + $0x570] ss:$36 sps:$4 sm:$0xff]  }
  0x92   :  { %1636 = vmatprep.subr.bf16.mxu1 %v4835_v60  ;;  %v4899_v59 = vld [vmem:[#allocation2 + $0x330] ss:$36 sps:$4 sm:$0xff]  }
  0x93   :  { %v4904_v60 = vld [vmem:[#allocation2 + $0x52c] ss:$36 sps:$4 sm:$0xff]  }
  0x94   :  { %1594 = vmatpush1.bf16.msra.mxu0 %v4791_v61  ;;  %v4907_v61 = vld [vmem:[#allocation2 + $0x2ec] ss:$36 sps:$4 sm:$0xff]  }
  0x95   :  { %1637 = vmatpush1.bf16.msra.mxu1 %v4833_v63  ;;  %1595 = vmatprep.subr.bf16.mxu0 %v4796_v62  ;;  %v4902_v62 = vld [vmem:[#allocation2 + $0x528] ss:$36 sps:$4 sm:$0xff]  }
  0x96   :  { %1638 = vmatprep.subr.bf16.mxu1 %v4841_v1  ;;  %v4905_v63 = vld [vmem:[#allocation2 + $0x2e8] ss:$36 sps:$4 sm:$0xff]  }
  0x97   :  { %v4910_v1 = vld [vmem:[#allocation2 + $0x4e4] ss:$36 sps:$4 sm:$0xff]  }
  0x98   :  { %1596 = vmatpush1.bf16.msra.mxu0 %v4794_v2  ;;  %v4913_v2 = vld [vmem:[#allocation2 + $0x2a4] ss:$36 sps:$4 sm:$0xff]  }
  0x99   :  { %1639 = vmatpush1.bf16.msra.mxu1 %v4839_v4  ;;  %1597 = vmatprep.subr.bf16.mxu0 %v4799_v3  ;;  %v4908_v3 = vld [vmem:[#allocation2 + $0x4e0] ss:$36 sps:$4 sm:$0xff]  }
  0x9a   :  { %1640 = vmatprep.subr.bf16.mxu1 %v4847_v5  ;;  %v4911_v4 = vld [vmem:[#allocation2 + $0x2a0] ss:$36 sps:$4 sm:$0xff]  }
  0x9b   :  { %v4916_v5 = vld [vmem:[#allocation2 + $0x49c] ss:$36 sps:$4 sm:$0xff]  }
  0x9c   :  { %1598 = vmatpush1.bf16.msra.mxu0 %v4797_v7  ;;  %v4919_v7 = vld [vmem:[#allocation2 + $0x25c] ss:$36 sps:$4 sm:$0xff]  }
  0x9d   :  { %1641 = vmatpush1.bf16.msra.mxu1 %v4845_v9  ;;  %1599 = vmatprep.subr.bf16.mxu0 %v4802_v8  ;;  %v4914_v8 = vld [vmem:[#allocation2 + $0x498] ss:$36 sps:$4 sm:$0xff]  }
  0x9e   :  { %1669 = vmatprep.subr.bf16.mxu1 %v4850_v10  ;;  %v4917_v9 = vld [vmem:[#allocation2 + $0x258] ss:$36 sps:$4 sm:$0xff]  }
  0x9f   :  { %v4920_v10 = vld [vmem:[#allocation2 + $0x458] ss:$36 sps:$4 sm:$0xff]  }
  0xa0   :  { %1659 = vmatmul.mubr.bf16.vlgmr.msra.gmra.mxu1 %v5205_v35  ;;  %1600 = vmatpush2.bf16.msra.mxu0 %v4800_v11  ;;  %v4857_v35 = vld [vmem:[#allocation2 + $0x138] ss:$36 sps:$4 sm:$0xff]  }
  0xa1   :  { %1670 = vmatpush1.bf16.msra.mxu1 %v4848_v13  ;;  %1601 = vmatprep.subr.bf16.mxu0 %v4808_v12  ;;  %v4921_v11 = vld [vmem:[#allocation2 + $0x218] ss:$36 sps:$4 sm:$0xff]   ;;  %v5164_v13 = vmov 0.0  }
  0xa2   :  { %1671 = vmatprep.subr.bf16.mxu1 %v4853_v14  ;;  %1701 = vmatprep.mubr.bf16.mxu1 %v5211_v51  ;;  %v4860_v51 = vld [vmem:[#allocation2 + $0xf0] ss:$36 sps:$4 sm:$0xff]   ;;  %v4922_v12 = vld [vmem:[#allocation2 + $0x698] ss:$36 sps:$4 sm:$0xff]  }
  0xa3   :  { %v4923_v14 = vld [vmem:[#allocation2 + $0x410] ss:$36 sps:$4 sm:$0xff]  }
  0xa4   :  { %1602 = vmatpush2.bf16.msra.mxu0 %v4806_v15  ;;  %v5088_v15 = vld [vmem:[%s5617_s0 + $0x8] ss:$12 sps:$4 sm:$0xff]  }
  0xa5   :  { %1672 = vmatpush1.bf16.msra.mxu1 %v4851_v17  ;;  %1603 = vmatprep.subr.bf16.mxu0 %v4814_v16  ;;  %v5089_v16 = vld [vmem:[%s5617_s0] ss:$12 sps:$4 sm:$0xff]   ;;  %v4924_v17 = vld [vmem:[#allocation2 + $0x1d0] ss:$36 sps:$4 sm:$0xff]  }
  0xa6   :  { %1673 = vmatprep.subr.bf16.mxu1 %v4856_v18  ;;  %v4925_v18 = vld [vmem:[#allocation2 + $0x650] ss:$36 sps:$4 sm:$0xff]  }
  0xa8   :  { %1604 = vmatpush2.bf16.msra.mxu0 %v4812_v19  ;;  %v4926_v19 = vld [vmem:[#allocation2 + $0x3c8] ss:$36 sps:$4 sm:$0xff]  }
  0xa9   :  { %1674 = vmatpush1.bf16.msra.mxu1 %v4854_v21  ;;  %1605 = vmatprep.subr.bf16.mxu0 %v4820_v20  ;;  %v5090_v20 = vld [vmem:[%s5617_s0 + $0x4] ss:$12 sps:$4 sm:$0xff]   ;;  %v4927_v21 = vld [vmem:[#allocation2 + $0x188] ss:$36 sps:$4 sm:$0xff]   ;;  %s5166_s0 = smov 64  }
  0xaa   :  { %1675 = vmatprep.subr.bf16.mxu1 %v4859_v22  ;;  %v4928_v22 = vld [vmem:[#allocation2 + $0x608] ss:$36 sps:$4 sm:$0xff]  }
  0xac   :  { %1606 = vmatpush2.bf16.msra.mxu0 %v4818_v23  ;;  %v4929_v23 = vld [vmem:[#allocation2 + $0x380] ss:$36 sps:$4 sm:$0xff]  }
  0xad   :  { %1676 = vmatpush1.bf16.msra.mxu1 %v4857_v35  ;;  %1607 = vmatprep.subr.bf16.mxu0 %v4826_v24  ;;  %v4930_v24 = vld [vmem:[#allocation2 + $0x140] ss:$36 sps:$4 sm:$0xff]  }
  0xae   :  { %1677 = vmatprep.subr.bf16.mxu1 %v4862_v25  ;;  %v4931_v35 = vld [vmem:[#allocation2 + $0x5c0] ss:$36 sps:$4 sm:$0xff]   ;;  %v4932_v25 = vld [vmem:[#allocation2 + $0x338] ss:$36 sps:$4 sm:$0xff]  }
  0xb0   :  { %1608 = vmatpush2.bf16.msra.mxu0 %v4824_v26  ;;  %v4933_v26 = vld [vmem:[#allocation2 + $0xf8] ss:$36 sps:$4 sm:$0xff]  }
  0xb1   :  { %1678 = vmatpush1.bf16.msra.mxu1 %v4860_v51  ;;  %1609 = vmatprep.subr.bf16.mxu0 %v4832_v27  ;;  %v4934_v27 = vld [vmem:[#allocation2 + $0x578] ss:$36 sps:$4 sm:$0xff]   ;;  %v4935_v51 = vld [vmem:[#allocation2 + $0x2f0] ss:$36 sps:$4 sm:$0xff]  }
  0xb2   :  { %1679 = vmatprep.subr.bf16.mxu1 %v4865_v28  ;;  %v4936_v28 = vld [vmem:[#allocation2 + $0xb0] ss:$36 sps:$4 sm:$0xff]  }
  0xb4   :  { %1610 = vmatpush2.bf16.msra.mxu0 %v4830_v29  ;;  %v4937_v29 = vld [vmem:[#allocation2 + $0x530] ss:$36 sps:$4 sm:$0xff]  }
  0xb5   :  { %1680 = vmatpush1.bf16.msra.mxu1 %v4863_v31  ;;  %1611 = vmatprep.subr.bf16.mxu0 %v4838_v30  ;;  %v4938_v30 = vld [vmem:[#allocation2 + $0x2a8] ss:$36 sps:$4 sm:$0xff]  }
  0xb6   :  { %1681 = vmatprep.subr.bf16.mxu1 %v4868_v32  ;;  %v4939_v31 = vld [vmem:[#allocation2 + $0x68] ss:$36 sps:$4 sm:$0xff]  }
  0xb7   :  { %v4940_v32 = vld [vmem:[#allocation2 + $0x4e8] ss:$36 sps:$4 sm:$0xff]  }
  0xb8   :  { %1612 = vmatpush2.bf16.msra.mxu0 %v4836_v33  ;;  %v4941_v33 = vld [vmem:[#allocation2 + $0x260] ss:$36 sps:$4 sm:$0xff]  }
  0xb9   :  { %1682 = vmatpush1.bf16.msra.mxu1 %v4866_v36  ;;  %1613 = vmatprep.subr.bf16.mxu0 %v4844_v34  ;;  %v4942_v34 = vld [vmem:[#allocation2 + $0x20] ss:$36 sps:$4 sm:$0xff]  }
  0xba   :  { %1683 = vmatprep.subr.bf16.mxu1 %v4871_v37  ;;  %v4943_v36 = vld [vmem:[#allocation2 + $0x4a0] ss:$36 sps:$4 sm:$0xff]  }
  0xbc   :  { %1614 = vmatpush2.bf16.msra.mxu0 %v4842_v38 }
  0xbd   :  { %1684 = vmatpush1.bf16.msra.mxu1 %v4869_v39  ;;  %1712 = vmatprep.subr.bf16.mxu0 %v4874_v40 }
  0xbe   :  { %1685 = vmatprep.subr.bf16.mxu1 %v4877_v41 }
  0xbf   :  { %1616 = vmatmul.mubr.bf16.vlgmr.msra.gmra.mxu0 %v5218_v6  ;;  %v4901_v6 = vld [vmem:[#allocation2 + $0x334] ss:$36 sps:$4 sm:$0xff]  }
  0xc0   :  { %1713 = vmatpush1.bf16.msra.mxu0 %v4872_v42  ;;  %1744 = vmatprep.mubr.bf16.mxu0 %v5163_v0 }
  0xc1   :  { %1686 = vmatpush2.bf16.msra.mxu1 %v4875_v43  ;;  %1714 = vmatprep.subr.bf16.mxu0 %v4880_v44 }
  0xc2   :  { %1687 = vmatprep.subr.bf16.mxu1 %v4883_v45 }
  0xc4   :  { %1715 = vmatpush1.bf16.msra.mxu0 %v4878_v46 }
  0xc5   :  { %1688 = vmatpush2.bf16.msra.mxu1 %v4881_v47  ;;  %1716 = vmatprep.subr.bf16.mxu0 %v4886_v48 }
  0xc6   :  { %1689 = vmatprep.subr.bf16.mxu1 %v4889_v49 }
  0xc8   :  { %1717 = vmatpush1.bf16.msra.mxu0 %v4884_v50 }
  0xc9   :  { %1690 = vmatpush2.bf16.msra.mxu1 %v4887_v52  ;;  %1718 = vmatprep.subr.bf16.mxu0 %v4892_v53 }
  0xca   :  { %1691 = vmatprep.subr.bf16.mxu1 %v4895_v54 }
  0xcc   :  { %1719 = vmatpush1.bf16.msra.mxu0 %v4890_v55 }
  0xcd   :  { %1692 = vmatpush2.bf16.msra.mxu1 %v4893_v56  ;;  %1720 = vmatprep.subr.bf16.mxu0 %v4898_v57 }
  0xce   :  { %1693 = vmatprep.subr.bf16.mxu1 %v4901_v6 }
  0xd0   :  { %1721 = vmatpush1.bf16.msra.mxu0 %v4896_v58 }
  0xd1   :  { %1694 = vmatpush2.bf16.msra.mxu1 %v4899_v59  ;;  %1722 = vmatprep.subr.bf16.mxu0 %v4904_v60 }
  0xd2   :  { %1695 = vmatprep.subr.bf16.mxu1 %v4907_v61 }
  0xd4   :  { %1723 = vmatpush1.bf16.msra.mxu0 %v4902_v62 }
  0xd5   :  { %1696 = vmatpush2.bf16.msra.mxu1 %v4905_v63  ;;  %1724 = vmatprep.subr.bf16.mxu0 %v4910_v1 }
  0xd6   :  { %1697 = vmatprep.subr.bf16.mxu1 %v4913_v2 }
  0xd8   :  { %1725 = vmatpush1.bf16.msra.mxu0 %v4908_v3 }
  0xd9   :  { %1698 = vmatpush2.bf16.msra.mxu1 %v4911_v4  ;;  %1726 = vmatprep.subr.bf16.mxu0 %v4916_v5 }
  0xda   :  { %1699 = vmatprep.subr.bf16.mxu1 %v4919_v7 }
  0xdc   :  { %1727 = vmatpush1.bf16.msra.mxu0 %v4914_v8 }
  0xdd   :  { %1700 = vmatpush2.bf16.msra.mxu1 %v4917_v9  ;;  %4306 = vmatprep.subr.bf16.mxu0 %v4920_v10 }
  0xde   :  { %4416 = vmatprep.subr.bf16.mxu1 %v5164_v13 }
  0xdf   :  { %1745 = vmatmul.mubr.bf16.vlgmr.msra.gmra.mxu0 %v5088_v15 }
  0xe0   :  { %1702 = vmatmul.mubr.bf16.vlgmr.msra.gmra.mxu1 %v5089_v16  ;;  %4307 = vmatpush3.bf16.msra.mxu0 %v4921_v11 }
  0xe1   :  { %4417 = vmatpush3.bf16.msra.mxu1 %v4922_v12  ;;  %4308 = vmatprep.subr.bf16.mxu0 %v4923_v14 }
  0xe2   :  { %4418 = vmatprep.subr.bf16.mxu1 %v5164_v13  ;;  %1787 = vmatprep.mubr.bf16.mxu0 %v5090_v20 }
  0xe3   :  { %4432 = vmatprep.mubr.msk.bf16.mxu1 %vm5165_vm0, %v5164_v13 }
  0xe4   :  { %4309 = vmatpush3.bf16.msra.mxu0 %v4924_v17 }
  0xe5   :  { %4419 = vmatpush3.bf16.msra.mxu1 %v4925_v18  ;;  %4310 = vmatprep.subr.bf16.mxu0 %v4926_v19 }
  0xe6   :  { %4420 = vmatprep.subr.bf16.mxu1 %v5164_v13 }
  0xe8   :  { %4311 = vmatpush3.bf16.msra.mxu0 %v4927_v21 }
  0xe9   :  { %4421 = vmatpush3.bf16.msra.mxu1 %v4928_v22  ;;  %4312 = vmatprep.subr.bf16.mxu0 %v4929_v23 }
  0xea   :  { %4422 = vmatprep.subr.bf16.mxu1 %v5164_v13 }
  0xec   :  { %4313 = vmatpush3.bf16.msra.mxu0 %v4930_v24 }
  0xed   :  { %4423 = vmatpush3.bf16.msra.mxu1 %v4931_v35  ;;  %4314 = vmatprep.subr.bf16.mxu0 %v4932_v25 }
  0xee   :  { %4424 = vmatprep.subr.bf16.mxu1 %v5164_v13 }
  0xf0   :  { %4315 = vmatpush3.bf16.msra.mxu0 %v4933_v26 }
  0xf1   :  { %4425 = vmatpush3.bf16.msra.mxu1 %v4934_v27  ;;  %4316 = vmatprep.subr.bf16.mxu0 %v4935_v51 }
  0xf2   :  { %4426 = vmatprep.subr.bf16.mxu1 %v5164_v13 }
  0xf4   :  { %4317 = vmatpush3.bf16.msra.mxu0 %v4936_v28 }
  0xf5   :  { %4427 = vmatpush3.bf16.msra.mxu1 %v4937_v29  ;;  %4318 = vmatprep.subr.bf16.mxu0 %v4938_v30 }
  0xf6   :  { %4428 = vmatprep.subr.bf16.mxu1 %v5164_v13 }
  0xf8   :  { %4319 = vmatpush3.bf16.msra.mxu0 %v4939_v31 }
  0xf9   :  { %4429 = vmatpush3.bf16.msra.mxu1 %v4940_v32  ;;  %4320 = vmatprep.subr.bf16.mxu0 %v4941_v33 }
  0xfa   :  { %4430 = vmatprep.subr.bf16.mxu1 %v5164_v13 }
  0xfc   :  { %4321 = vmatpush3.bf16.msra.mxu0 %v4942_v34 }
  0xfd   :  { %4431 = vmatpush3.bf16.msra.mxu1 %v4943_v36  ;;  %4460 = vmatprep.subr.bf16.mxu0 %v5164_v13 }
  0xfe   :  { %4436 = vmatprep.subr.bf16.mxu1 %v5164_v13 }
  0xff   :  { %1788 = vmatmul.mubr.bf16.vlgmr.msra.gmra.mxu0 %v5089_v16 }
 0x100   :  { %4433 = vmatmul.mubr.bf16.vlgmr.msra.gmra.mxu1 %v5088_v15  ;;  %4462 = vmatprep.mubr.msk.bf16.mxu0 %vm5165_vm0, %v5164_v13  ;;  %v1488_v37 = vpop.f32.mrf.mxu1 }
 0x101   :  { %4438 = vmatprep.mubr.msk.bf16.mxu1 %vm5165_vm0, %v5164_v13 }
 0x102   :  { %v1490_v38 = vpop.f32.mrf.mxu1 }
 0x104   :  { %v1492_v40 = vpop.f32.mrf.mxu1 }
 0x106   :  { %v1494_v44 = vpop.f32.mrf.mxu1 }
 0x11f   :  { %v1445_v39 = vpop.f32.mrf.mxu0 }
 0x120   :  { %v1489_v61 = vadd.f32 %v1488_v37, %v1445_v39 }
 0x121   :  { %v1447_v41 = vpop.f32.mrf.mxu0 }
 0x122   :  { %v5255_v42 = vadd.f32 %v1490_v38, %v1447_v41  ;;  %v5270_v63 = vpack.c.bf16 %v1489_v61, %v1489_v61 }
 0x123   :  { %v1449_v43 = vpop.f32.mrf.mxu0 }
 0x124   :  { %v1493_v2 = vadd.f32 %v1492_v40, %v1449_v43  ;;  %v1846_v43 = vlaneseq }
 0x125   :  { %v1451_v45 = vpop.f32.mrf.mxu0 }
 0x126   :  { %v5257_v46 = vadd.f32 %v1494_v44, %v1451_v45  ;;  %v5279_v3 = vpack.c.bf16 %v1493_v2, %v1493_v2  ;;  %v5310_v44 = vshrl.u32 %v1846_v43, 7  ;;  %v1849_v45 = vand.u32 127, %v1846_v43 }
 0x128   :  { %vm5313_vm3 = vcmp.le.s32.totalorder %v1849_v45, %v5310_v44 }
 0x13f   :  { %v1574_v48 = vpop.f32.mrf.mxu0 }
 0x140   :  { %v1531_v47 = vpop.f32.mrf.mxu1 }
 0x141   :  { %v5259_v49 = vadd.f32 %v1574_v48, %v1531_v47  ;;  %v1576_v52 = vpop.f32.mrf.mxu0 }
 0x142   :  { %v1533_v50 = vpop.f32.mrf.mxu1 }
 0x143   :  { %v1577_v53 = vadd.f32 %v1576_v52, %v1533_v50  ;;  %v1578_v55 = vpop.f32.mrf.mxu0 }
 0x144   :  { %v1535_v54 = vpop.f32.mrf.mxu1 }
 0x145   :  { %v5261_v56 = vpack.c.bf16 %v1577_v53, %v1577_v53  ;;  %v5263_v57 = vadd.f32 %v1578_v55, %v1535_v54  ;;  %v1580_v58 = vpop.f32.mrf.mxu0 }
 0x146   :  { %v1537_v6 = vpop.f32.mrf.mxu1 }
 0x147   :  { %v1873_v59 = vsel %vm1868_vm1, %v5261_v56, 0  ;;  %v1581_v60 = vadd.f32 %v1580_v58, %v1537_v6 }
 0x148   :  { %4437 = vmatpush3.bf16.xpose.msra.mxu1 %v1873_v59 }
 0x149   :  { %4442 = vmatprep.subr.bf16.mxu1 %v5164_v13  ;;  %v5268_v62 = vpack.c.bf16 %v1581_v60, %v1581_v60 }
 0x14b   :  { %v1919_v1 = vsel %vm1868_vm1, %v5268_v62, 0 }
 0x14f   :  { %4439 = vmatmul.mubr.msk.bf16.vlgmr.msra.gmra.mxu1 %vm1868_vm1, %v5270_v63 }
 0x150   :  { %4443 = vmatpush3.bf16.xpose.msra.mxu1 %v1919_v1  ;;  %4444 = vmatprep.mubr.msk.bf16.mxu1 %vm5165_vm0, %v5164_v13 }
 0x151   :  { %4448 = vmatprep.subr.bf16.mxu1 %v5164_v13 }
 0x157   :  { %4445 = vmatmul.mubr.msk.bf16.vlgmr.msra.gmra.mxu1 %vm1868_vm1, %v5279_v3 }
 0x158   :  { %4450 = vmatprep.mubr.msk.bf16.mxu1 %vm5165_vm0, %v5164_v13 }
 0x160   :  { %v1660_v4 = vpop.f32.mrf.mxu1 }
 0x162   :  { %v1662_v5 = vpop.f32.mrf.mxu1 }
 0x164   :  { %v1664_v8 = vpop.f32.mrf.mxu1 }
 0x166   :  { %v1666_v14 = vpop.f32.mrf.mxu1 }
 0x17f   :  { %v1617_v7 = vpop.f32.mrf.mxu0 }
 0x180   :  { %v5285_v9 = vadd.f32 %v1660_v4, %v1617_v7 }
 0x181   :  { %v1619_v10 = vpop.f32.mrf.mxu0 }
 0x182   :  { %v5287_v11 = vadd.f32 %v1662_v5, %v1619_v10 }
 0x183   :  { %v1621_v12 = vpop.f32.mrf.mxu0 }
 0x184   :  { %v5289_v15 = vadd.f32 %v1664_v8, %v1621_v12 }
 0x185   :  { %v1623_v16 = vpop.f32.mrf.mxu0 }
 0x186   :  { %v5291_v17 = vadd.f32 %v1666_v14, %v1623_v16 }
 0x19f   :  { %v1746_v19 = vpop.f32.mrf.mxu0 }
 0x1a0   :  { %v1703_v18 = vpop.f32.mrf.mxu1 }
 0x1a1   :  { %v1747_v20 = vadd.f32 %v1746_v19, %v1703_v18  ;;  %v1748_v22 = vpop.f32.mrf.mxu0 }
 0x1a2   :  { %v1705_v21 = vpop.f32.mrf.mxu1 }
 0x1a3   :  { %v5293_v23 = vpack.c.bf16 %v1747_v20, %v1747_v20  ;;  %v5295_v24 = vadd.f32 %v1748_v22, %v1705_v21  ;;  %v5299_v25 = vpop.f32.mrf.mxu0 }
 0x1a4   :  { %v5297_v35 = vpop.f32.mrf.mxu1 }
 0x1a5   :  { %v1999_v26 = vsel %vm1997_vm2, %v5293_v23, 0  ;;  %v1752_v51 = vpop.f32.mrf.mxu0 }
 0x1a6   :  { %v1709_v27 = vpop.f32.mrf.mxu1  ;;  %4449 = vmatpush3.bf16.msra.mxu1 %v1999_v26  ;;  %v1751_v26 = vadd.f32 %v5299_v25, %v5297_v35 }
 0x1a7   :  { %v5303_v28 = vadd.f32 %v1752_v51, %v1709_v27  ;;  %4454 = vmatprep.subr.bf16.mxu1 %v5164_v13 }
 0x1bf   :  { %v4322_v29 = vpop.f32.mrf.mxu0 }
 0x1c0   :  { %v1830_v30 = vpop.f32.mrf.mxu1 }
 0x1c1   :  { %v4323_v31 = vpop.f32.mrf.mxu0 }
 0x1c2   :  { %v4434_v32 = vpop.f32.mrf.mxu1  ;;  %v4324_v33 = vadd.f32 %v4323_v31, %v4322_v29 }
 0x1c3   :  { %v4325_v34 = vpop.f32.mrf.mxu0 }
 0x1c4   :  { %v1833_v36 = vpop.f32.mrf.mxu1  ;;  %v5306_v37 = vadd.f32 %v4324_v33, %v1830_v30 }
 0x1c5   :  { %v4326_v38 = vpop.f32.mrf.mxu0 }
 0x1c6   :  { %v4435_v39 = vpop.f32.mrf.mxu1  ;;  %v4327_v40 = vadd.f32 %v4326_v38, %v4325_v34 }
 0x1c8   :  { %v5308_v41 = vadd.f32 %v4327_v40, %v1833_v36 }
 0x20f   :  { %v1909_v47 = vpop.f32.mrf.mxu1 }
 0x210   :  { %v1961_v48 = vmul.f32 0.125, %v1909_v47 }
 0x211   :  { %v4440_v52 = vpop.f32.mrf.mxu1 }
 0x212   :  { %vm1963_vm4 = vcmp.ne.f32.partialorder %v1961_v48, 0.0 }
 0x213   :  { %v1912_v53 = vpop.f32.mrf.mxu1  ;;  %vm1965_vm6 = vmand %vm5313_vm3, %vm1963_vm4 }
 0x214   :  { %v1967_v54 = vsel %vm1965_vm6, %v1961_v48, -inf }
 0x215   :  { %v4441_v55 = vpop.f32.mrf.mxu1  ;;  %v1970_v6 = vsel %vm1969_vm5, %v1967_v54, -inf }
 0x216   :  { %1971 = vmax.xlane.f32.xlu0 %v1970_v6 }
 0x217   :  { %v1955_v58 = vpop.f32.mrf.mxu1 }
 0x218   :  { %v1962_v59 = vmul.f32 0.125, %v1955_v58 }
 0x219   :  { %v4446_v60 = vpop.f32.mrf.mxu1 }
 0x21a   :  { %vm1964_vm7 = vcmp.ne.f32.partialorder %v1962_v59, 0.0 }
 0x21b   :  { %v1958_v61 = vpop.f32.mrf.mxu1  ;;  %vm1966_vm8 = vmand %vm5313_vm3, %vm1964_vm7 }
 0x21c   :  { %v1968_v1 = vsel %vm1966_vm8, %v1962_v59, -inf }
 0x21d   :  { %v4447_v2 = vpop.f32.mrf.mxu1  ;;  %v1973_v4 = vsel %vm1969_vm5, %v1968_v1, -inf }
 0x21e   :  { %1974 = vmax.xlane.f32.xlu0 %v1973_v4 }
 0x234   :  { %2089 = vrot.lane.b32.xlu0 %v5261_v56, %s5166_s0 }
 0x29f   :  { %v1972_v5 = vpop.xlane.xlu0 %1971 }
 0x2a0   :  { %v1976_v7 = vsub.f32 %v1967_v54, %v1972_v5 }
 0x2a2   :  { %v1978_v8 = vmul.f32 1.442695, %v1976_v7 }
 0x2a4   :  { %5040 = vpow2.f32 %v1978_v8 }
 0x2a7   :  { %v1975_v10 = vpop.xlane.xlu0 %1974 }
 0x2a8   :  { %v1977_v19 = vsub.f32 %v1968_v1, %v1975_v10 }
 0x2aa   :  { %v1980_v56 = vmul.f32 1.442695, %v1977_v19 }
 0x2ab   :  { %v2090_v12 = vpop.permute.xlu0 %2089 }
 0x2ac   :  { %v2095_v14 = vsel %vm1868_vm1, %v2090_v12, 0  ;;  %5042 = vpow2.f32 %v1980_v56 }
 0x2ad   :  { %4461 = vmatpush3.bf16.xpose.msra.mxu0 %v2095_v14 }
 0x2ae   :  { %4472 = vmatprep.subr.bf16.mxu0 %v5164_v13 }
 0x2b1   :  { %v5041_v16 = vpop.eup %5040 }
 0x2b2   :  { %v1982_v18 = vsel %vm1969_vm5, %v5041_v16, 0.0 }
 0x2b3   :  { %1983 = vadd.xlane.f32.xlu1 %v1982_v18 }
 0x2b9   :  { %v5043_v20 = vpop.eup %5042 }
 0x2ba   :  { %v1985_v21 = vsel %vm1969_vm5, %v5043_v20, 0.0 }
 0x2c4   :  { %2139 = vrot.lane.b32.xlu1 %v5268_v62, %s5166_s0  ;;  %v4293_v62 = vpack.c.bf16 %v1751_v26, %v1751_v26 }
 0x2c6   :  { %v2045_v30 = vsel %vm1997_vm2, %v4293_v62, 0 }
 0x2e8   :  { %1986 = vadd.xlane.f32.xlu1 %v1985_v21 }
 0x2f9   :  { %2087 = vrot.lane.b32.xlu1 %v5270_v63, %s5166_s0 }
 0x2fd   :  { %2137 = vrot.lane.b32.xlu1 %v5279_v3, %s5166_s0 }
 0x33c   :  { %v1984_v22 = vpop.xlane.xlu1 %1983 }
 0x33d   :  { %5044 = vrcp.f32 %v1984_v22 }
 0x340   :  { %v2140_v63 = vpop.permute.xlu1 %2139 }
 0x341   :  { %v2145_v33 = vsel %vm1868_vm1, %v2140_v63, 0  ;;  %v5372_v63 = vpack.c.bf16 %v5285_v9, %v5285_v9  ;;  %v5384_v9 = vpack.c.bf16 %v5295_v24, %v5295_v24 }
 0x34a   :  { %v5045_v27 = vpop.eup %5044 }
 0x34b   :  { %v1990_v51 = vmul.f32 %v5045_v27, %v5041_v16 }
 0x34d   :  { %v1992_v29 = vpack.c.bf16 %v1990_v51, %v1990_v51 }
 0x34f   :  { %4451 = vmatmul.mubr.msk.bf16.vlgmr.msra.gmra.mxu1 %vm1969_vm5, %v1992_v29 }
 0x350   :  { %4455 = vmatpush3.bf16.msra.mxu1 %v2045_v30  ;;  %4456 = vmatprep.mubr.msk.bf16.mxu1 %vm5165_vm0, %v5164_v13 }
 0x351   :  { %4466 = vmatprep.subr.bf16.mxu1 %v5164_v13 }
 0x371   :  { %v1987_v3 = vpop.xlane.xlu1 %1986 }
 0x372   :  { %5046 = vrcp.f32 %v1987_v3 }
 0x375   :  { %v2088_v31 = vpop.permute.xlu1 %2087 }
 0x376   :  { %4463 = vmatmul.mubr.msk.bf16.vlgmr.msra.gmra.mxu0 %vm1868_vm1, %v2088_v31 }
 0x377   :  { %4474 = vmatprep.mubr.msk.bf16.mxu0 %vm5165_vm0, %v5164_v13 }
 0x379   :  { %v2138_v34 = vpop.permute.xlu1 %2137 }
 0x37f   :  { %v5047_v35 = vpop.eup %5046 }
 0x380   :  { %v1991_v25 = vmul.f32 %v5047_v35, %v5043_v20 }
 0x382   :  { %v1993_v32 = vpack.c.bf16 %v1991_v25, %v1991_v25  ;;  %v5388_v25 = vpack.c.bf16 %v5255_v42, %v5255_v42  ;;  %v5406_v42 = vpack.c.bf16 %v5303_v28, %v5303_v28 }
 0x384   :  { %4457 = vmatmul.mubr.msk.bf16.vlgmr.msra.gmra.mxu1 %vm1969_vm5, %v1993_v32  ;;  %v4297_v32 = vpack.c.bf16 %v5289_v15, %v5289_v15  ;;  %v4295_v15 = vpack.c.bf16 %v5257_v46, %v5257_v46 }
 0x385   :  { %4467 = vmatpush3.bf16.xpose.msra.mxu1 %v2145_v33  ;;  %4468 = vmatprep.mubr.msk.bf16.mxu1 %vm5165_vm0, %v5164_v13 }
 0x386   :  { %4478 = vmatprep.subr.bf16.mxu1 %v5164_v13  ;;  %v2380_v24 = vsel %vm1868_vm1, %v4297_v32, 0 }
 0x38c   :  { %4469 = vmatmul.mubr.msk.bf16.vlgmr.msra.gmra.mxu1 %vm1868_vm1, %v2138_v34  ;;  %v2458_v34 = vsel %vm1997_vm2, %v5384_v9, 0 }
 0x38d   :  { %4480 = vmatprep.mubr.msk.bf16.mxu1 %vm5165_vm0, %v5164_v13 }
 0x40f   :  { %v5353_v36 = vpop.f32.mrf.mxu1 }
 0x411   :  { %v4452_v38 = vpop.f32.mrf.mxu1 }
 0x413   :  { %v2038_v39 = vpop.f32.mrf.mxu1 }
 0x414   :  { %v2504_v39 = vsel %vm1997_vm2, %v5406_v42, 0 }
 0x415   :  { %v4453_v40 = vpop.f32.mrf.mxu1 }
 0x436   :  { %v2131_v43 = vpop.f32.mrf.mxu0 }
 0x437   :  { %v2187_v45 = vmul.f32 0.125, %v2131_v43 }
 0x438   :  { %v4464_v47 = vpop.f32.mrf.mxu0 }
 0x439   :  { %vm2189_vm9 = vcmp.ne.f32.partialorder %v2187_v45, 0.0 }
 0x43a   :  { %v2134_v48 = vpop.f32.mrf.mxu0  ;;  %vm2191_vm10 = vmand %vm5313_vm3, %vm2189_vm9 }
 0x43b   :  { %v2193_v52 = vsel %vm2191_vm10, %v2187_v45, -inf }
 0x43c   :  { %v4465_v53 = vpop.f32.mrf.mxu0  ;;  %v2195_v54 = vsel %vm1969_vm5, %v2193_v52, -inf }
 0x43d   :  { %2196 = vmax.xlane.f32.xlu0 %v2195_v54 }
 0x444   :  { %v5358_v55 = vpop.f32.mrf.mxu1 }
 0x446   :  { %v4458_v6 = vpop.f32.mrf.mxu1 }
 0x448   :  { %v2084_v58 = vpop.f32.mrf.mxu1 }
 0x44a   :  { %v4459_v59 = vpop.f32.mrf.mxu1 }
 0x44c   :  { %v2181_v60 = vpop.f32.mrf.mxu1 }
 0x44d   :  { %v2188_v61 = vmul.f32 0.125, %v2181_v60 }
 0x44e   :  { %v4470_v1 = vpop.f32.mrf.mxu1 }
 0x44f   :  { %vm2190_vm11 = vcmp.ne.f32.partialorder %v2188_v61, 0.0 }
 0x450   :  { %v2184_v2 = vpop.f32.mrf.mxu1  ;;  %vm2192_vm12 = vmand %vm5313_vm3, %vm2190_vm11 }
 0x451   :  { %v2194_v4 = vsel %vm2192_vm12, %v2188_v61, -inf }
 0x452   :  { %v4471_v5 = vpop.f32.mrf.mxu1  ;;  %v2198_v7 = vsel %vm1969_vm5, %v2194_v4, -inf }
 0x453   :  { %2199 = vmax.xlane.f32.xlu1 %v2198_v7 }
 0x464   :  { %2267 = vrot.lane.b32.xlu1 %v4293_v62, %s5166_s0 }
 0x4c6   :  { %v2197_v8 = vpop.xlane.xlu0 %2196 }
 0x4c7   :  { %v2201_v10 = vsub.f32 %v2193_v52, %v2197_v8 }
 0x4c9   :  { %v2203_v12 = vmul.f32 1.442695, %v2201_v10 }
 0x4cb   :  { %5048 = vpow2.f32 %v2203_v12 }
 0x4d8   :  { %v5049_v14 = vpop.eup %5048 }
 0x4d9   :  { %v2207_v16 = vsel %vm1969_vm5, %v5049_v14, 0.0 }
 0x4da   :  { %2208 = vadd.xlane.f32.xlu0 %v2207_v16 }
 0x4dc   :  { %v2200_v18 = vpop.xlane.xlu1 %2199 }
 0x4dd   :  { %v2202_v19 = vsub.f32 %v2194_v4, %v2200_v18 }
 0x4df   :  { %v2205_v56 = vmul.f32 1.442695, %v2202_v19 }
 0x4e0   :  { %v2268_v20 = vpop.permute.xlu1 %2267 }
 0x4e1   :  { %5050 = vpow2.f32 %v2205_v56  ;;  %v2273_v21 = vsel %vm1997_vm2, %v2268_v20, 0 }
 0x4e2   :  { %4479 = vmatpush3.bf16.msra.mxu1 %v2273_v21 }
 0x4e3   :  { %4490 = vmatprep.subr.bf16.mxu1 %v5164_v13 }
 0x4ee   :  { %v5051_v22 = vpop.eup %5050 }
 0x4ef   :  { %v2210_v26 = vsel %vm1969_vm5, %v5051_v22, 0.0 }
 0x4f0   :  { %2211 = vadd.xlane.f32.xlu0 %v2210_v26 }
 0x506   :  { %2219 = vrot.lane.b32.xlu0 %v5293_v23, %s5166_s0  ;;  %v2334_v23 = vsel %vm1868_vm1, %v5372_v63, 0 }
 0x563   :  { %v2209_v27 = vpop.xlane.xlu0 %2208 }
 0x564   :  { %5052 = vrcp.f32 %v2209_v27 }
 0x571   :  { %v5053_v62 = vpop.eup %5052 }
 0x572   :  { %v2215_v29 = vmul.f32 %v5053_v62, %v5049_v14 }
 0x574   :  { %v2217_v31 = vpack.c.bf16 %v2215_v29, %v2215_v29 }
 0x579   :  { %v2212_v51 = vpop.xlane.xlu0 %2211 }
 0x57a   :  { %5054 = vrcp.f32 %v2212_v51 }
 0x57d   :  { %v2220_v30 = vpop.permute.xlu0 %2219 }
 0x57e   :  { %v2225_v3 = vsel %vm1997_vm2, %v2220_v30, 0 }
 0x57f   :  { %4473 = vmatpush3.bf16.msra.mxu0 %v2225_v3 }
 0x580   :  { %4484 = vmatprep.subr.bf16.mxu0 %v5164_v13 }
 0x582   :  { %4475 = vmatmul.mubr.msk.bf16.vlgmr.msra.gmra.mxu0 %vm1969_vm5, %v2217_v31 }
 0x583   :  { %4485 = vmatpush3.bf16.xpose.msra.mxu0 %v2334_v23  ;;  %4486 = vmatprep.mubr.msk.bf16.mxu0 %vm5165_vm0, %v5164_v13 }
 0x584   :  { %4496 = vmatprep.subr.bf16.mxu0 %v5164_v13 }
 0x587   :  { %v5055_v35 = vpop.eup %5054 }
 0x588   :  { %v2216_v33 = vmul.f32 %v5055_v35, %v5051_v22 }
 0x58a   :  { %4487 = vmatmul.mubr.msk.bf16.vlgmr.msra.gmra.mxu0 %vm1868_vm1, %v5388_v25  ;;  %v2218_v38 = vpack.c.bf16 %v2216_v33, %v2216_v33 }
 0x58b   :  { %4497 = vmatpush3.bf16.msra.mxu0 %v2458_v34  ;;  %4498 = vmatprep.mubr.msk.bf16.mxu0 %vm5165_vm0, %v5164_v13 }
 0x58c   :  { %4481 = vmatmul.mubr.msk.bf16.vlgmr.msra.gmra.mxu1 %vm1969_vm5, %v2218_v38  ;;  %4508 = vmatprep.subr.bf16.mxu0 %v5164_v13 }
 0x58d   :  { %4491 = vmatpush3.bf16.xpose.msra.mxu1 %v2380_v24  ;;  %4492 = vmatprep.mubr.msk.bf16.mxu1 %vm5165_vm0, %v5164_v13 }
 0x58e   :  { %4502 = vmatprep.subr.bf16.mxu1 %v5164_v13 }
 0x594   :  { %4493 = vmatmul.mubr.msk.bf16.vlgmr.msra.gmra.mxu1 %vm1868_vm1, %v4295_v15 }
 0x595   :  { %4503 = vmatpush3.bf16.msra.mxu1 %v2504_v39  ;;  %4504 = vmatprep.mubr.msk.bf16.mxu1 %vm5165_vm0, %v5164_v13 }
 0x596   :  { %4514 = vmatprep.subr.bf16.mxu1 %v5164_v13 }
 0x642   :  { %v5416_v40 = vpop.f32.mrf.mxu0 }
 0x644   :  { %v4476_v43 = vpop.f32.mrf.mxu0 }
 0x646   :  { %v2264_v45 = vpop.f32.mrf.mxu0 }
 0x648   :  { %v4477_v28 = vpop.f32.mrf.mxu0 }
 0x64a   :  { %v2370_v47 = vpop.f32.mrf.mxu0 }
 0x64b   :  { %v2422_v48 = vmul.f32 0.125, %v2370_v47 }
 0x64c   :  { %v5418_v52 = vpop.f32.mrf.mxu1  ;;  %v4488_v46 = vpop.f32.mrf.mxu0 }
 0x64d   :  { %vm2424_vm13 = vcmp.ne.f32.partialorder %v2422_v48, 0.0  ;;  %v4623_v53 = vpack.i.bf16 %v5418_v52, %v5416_v40  ;;  %v4944_v40 = vld [vmem:[#allocation5 + $0xa8] ss:$12 sps:$4 sm:$0xff]   ;;  %v4946_v52 = vld [vmem:[#allocation5 + $0xac] ss:$12 sps:$4 sm:$0xff]  }
 0x64e   :  { %v4482_v54 = vpop.f32.mrf.mxu1  ;;  %v2373_v6 = vpop.f32.mrf.mxu0  ;;  %vm2426_vm14 = vmand %vm5313_vm3, %vm2424_vm13 }
 0x64f   :  { %v2428_v58 = vsel %vm2426_vm14, %v2422_v48, -inf }
 0x650   :  { %v2312_v59 = vpop.f32.mrf.mxu1  ;;  %v4489_v60 = vpop.f32.mrf.mxu0  ;;  %v2430_v61 = vsel %vm1969_vm5, %v2428_v58, -inf }
 0x651   :  { %2431 = vmax.xlane.f32.xlu1 %v2430_v61 }
 0x652   :  { %v4483_v1 = vpop.f32.mrf.mxu1 }
 0x654   :  { %v2416_v2 = vpop.f32.mrf.mxu1 }
 0x655   :  { %v2423_v4 = vmul.f32 0.125, %v2416_v2 }
 0x656   :  { %v4494_v5 = vpop.f32.mrf.mxu1 }
 0x657   :  { %vm2425_vm15 = vcmp.ne.f32.partialorder %v2423_v4, 0.0 }
 0x658   :  { %v2419_v7 = vpop.f32.mrf.mxu1  ;;  %vm2427_vm4 = vmand %vm5313_vm3, %vm2425_vm15 }
 0x659   :  { %v2429_v8 = vsel %vm2427_vm4, %v2423_v4, -inf }
 0x65a   :  { %v4495_v10 = vpop.f32.mrf.mxu1  ;;  %v2433_v12 = vsel %vm1969_vm5, %v2429_v8, -inf }
 0x65b   :  { %2434 = vmax.xlane.f32.xlu0 %v2433_v12 }
 0x662   :  { %2598 = vrot.lane.b32.xlu1 %v4297_v32, %s5166_s0 }
 0x6da   :  { %v2432_v14 = vpop.xlane.xlu1 %2431 }
 0x6db   :  { %v2436_v16 = vsub.f32 %v2428_v58, %v2432_v14 }
 0x6dd   :  { %v2438_v18 = vmul.f32 1.442695, %v2436_v16 }
 0x6de   :  { %v2599_v51 = vpop.permute.xlu1 %2598 }
 0x6df   :  { %5056 = vpow2.f32 %v2438_v18  ;;  %v2604_v34 = vsel %vm1868_vm1, %v2599_v51, 0 }
 0x6e4   :  { %v2435_v19 = vpop.xlane.xlu0 %2434 }
 0x6e5   :  { %v2437_v56 = vsub.f32 %v2429_v8, %v2435_v19 }
 0x6e7   :  { %v2440_v20 = vmul.f32 1.442695, %v2437_v56 }
 0x6e9   :  { %5058 = vpow2.f32 %v2440_v20 }
 0x6ec   :  { %v5057_v21 = vpop.eup %5056 }
 0x6ed   :  { %v2442_v22 = vsel %vm1969_vm5, %v5057_v21, 0.0 }
 0x6ee   :  { %2443 = vadd.xlane.f32.xlu0 %v2442_v22 }
 0x6f6   :  { %v5059_v26 = vpop.eup %5058 }
 0x6f7   :  { %v2445_v27 = vsel %vm1969_vm5, %v5059_v26, 0.0 }
 0x6f8   :  { %2446 = vadd.xlane.f32.xlu1 %v2445_v27 }
 0x704   :  { %2548 = vrot.lane.b32.xlu0 %v5372_v63, %s5166_s0 }
 0x709   :  { %2546 = vrot.lane.b32.xlu1 %v5388_v25, %s5166_s0 }
 0x70d   :  { %2596 = vrot.lane.b32.xlu1 %v4295_v15, %s5166_s0 }
 0x777   :  { %v2444_v62 = vpop.xlane.xlu0 %2443 }
 0x778   :  { %5060 = vrcp.f32 %v2444_v62 }
 0x77b   :  { %v2549_v31 = vpop.permute.xlu0 %2548 }
 0x77c   :  { %v2554_v35 = vsel %vm1868_vm1, %v2549_v31, 0 }
 0x781   :  { %v2447_v29 = vpop.xlane.xlu1 %2446 }
 0x782   :  { %5062 = vrcp.f32 %v2447_v29 }
 0x785   :  { %v5061_v30 = vpop.eup %5060  ;;  %v2547_v32 = vpop.permute.xlu1 %2546 }
 0x786   :  { %v2450_v3 = vmul.f32 %v5061_v30, %v5057_v21 }
 0x788   :  { %v2452_v23 = vpack.c.bf16 %v2450_v3, %v2450_v3  ;;  %v5472_v3 = vpack.c.bf16 %v5287_v11, %v5287_v11  ;;  %v5484_v11 = vpack.c.bf16 %v5306_v37, %v5306_v37 }
 0x789   :  { %v2597_v38 = vpop.permute.xlu1 %2596 }
 0x78a   :  { %4499 = vmatmul.mubr.msk.bf16.vlgmr.msra.gmra.mxu0 %vm1969_vm5, %v2452_v23 }
 0x78b   :  { %4509 = vmatpush3.bf16.xpose.msra.mxu0 %v2554_v35  ;;  %4510 = vmatprep.mubr.msk.bf16.mxu0 %vm5165_vm0, %v5164_v13 }
 0x78c   :  { %4520 = vmatprep.subr.bf16.mxu0 %v5164_v13 }
 0x78f   :  { %v5063_v63 = vpop.eup %5062 }
 0x790   :  { %v2451_v25 = vmul.f32 %v5063_v63, %v5059_v26 }
 0x792   :  { %4511 = vmatmul.mubr.msk.bf16.vlgmr.msra.gmra.mxu0 %vm1868_vm1, %v2547_v32  ;;  %v2453_v33 = vpack.c.bf16 %v2451_v25, %v2451_v25  ;;  %v5488_v25 = vpack.c.bf16 %v5259_v49, %v5259_v49  ;;  %v4303_v32 = vpack.c.bf16 %v5291_v17, %v5291_v17  ;;  %v5506_v49 = vpack.c.bf16 %v5308_v41, %v5308_v41 }
 0x793   :  { %4522 = vmatprep.mubr.msk.bf16.mxu0 %vm5165_vm0, %v5164_v13  ;;  %v4301_v17 = vpack.c.bf16 %v5263_v57, %v5263_v57 }
 0x794   :  { %4505 = vmatmul.mubr.msk.bf16.vlgmr.msra.gmra.mxu1 %vm1969_vm5, %v2453_v33  ;;  %v2839_v37 = vsel %vm1868_vm1, %v4303_v32, 0 }
 0x795   :  { %4515 = vmatpush3.bf16.xpose.msra.mxu1 %v2604_v34  ;;  %4516 = vmatprep.mubr.msk.bf16.mxu1 %vm5165_vm0, %v5164_v13  ;;  %v2917_v34 = vsel %vm1997_vm2, %v5484_v11, 0 }
 0x796   :  { %4526 = vmatprep.subr.bf16.mxu1 %v5164_v13 }
 0x79c   :  { %4517 = vmatmul.mubr.msk.bf16.vlgmr.msra.gmra.mxu1 %vm1868_vm1, %v2597_v38 }
 0x79d   :  { %4528 = vmatprep.mubr.msk.bf16.mxu1 %vm5165_vm0, %v5164_v13 }
 0x84a   :  { %v5452_v24 = vpop.f32.mrf.mxu0 }
 0x84c   :  { %v4500_v15 = vpop.f32.mrf.mxu0 }
 0x84d   :  { %v2963_v15 = vsel %vm1997_vm2, %v5506_v49, 0 }
 0x84e   :  { %v2497_v39 = vpop.f32.mrf.mxu0 }
 0x850   :  { %v4501_v43 = vpop.f32.mrf.mxu0 }
 0x852   :  { %v2590_v45 = vpop.f32.mrf.mxu0 }
 0x853   :  { %v2646_v28 = vmul.f32 0.125, %v2590_v45 }
 0x854   :  { %v5454_v47 = vpop.f32.mrf.mxu1  ;;  %v4512_v48 = vpop.f32.mrf.mxu0 }
 0x855   :  { %vm2648_vm6 = vcmp.ne.f32.partialorder %v2646_v28, 0.0 }
 0x856   :  { %v4506_v46 = vpop.f32.mrf.mxu1  ;;  %v2593_v54 = vpop.f32.mrf.mxu0  ;;  %vm2650_vm7 = vmand %vm5313_vm3, %vm2648_vm6 }
 0x857   :  { %v2652_v6 = vsel %vm2650_vm7, %v2646_v28, -inf }
 0x858   :  { %v2543_v58 = vpop.f32.mrf.mxu1  ;;  %v4513_v59 = vpop.f32.mrf.mxu0  ;;  %v2654_v60 = vsel %vm1969_vm5, %v2652_v6, -inf }
 0x859   :  { %2655 = vmax.xlane.f32.xlu0 %v2654_v60 }
 0x85a   :  { %v4507_v61 = vpop.f32.mrf.mxu1 }
 0x85c   :  { %v2640_v1 = vpop.f32.mrf.mxu1 }
 0x85d   :  { %v2647_v2 = vmul.f32 0.125, %v2640_v1 }
 0x85e   :  { %v4518_v4 = vpop.f32.mrf.mxu1 }
 0x85f   :  { %vm2649_vm8 = vcmp.ne.f32.partialorder %v2647_v2, 0.0 }
 0x860   :  { %v2643_v5 = vpop.f32.mrf.mxu1  ;;  %vm2651_vm9 = vmand %vm5313_vm3, %vm2649_vm8 }
 0x861   :  { %v2653_v7 = vsel %vm2651_vm9, %v2647_v2, -inf }
 0x862   :  { %v4519_v8 = vpop.f32.mrf.mxu1  ;;  %v2657_v10 = vsel %vm1969_vm5, %v2653_v7, -inf }
 0x863   :  { %2658 = vmax.xlane.f32.xlu1 %v2657_v10 }
 0x874   :  { %2726 = vrot.lane.b32.xlu1 %v5406_v42, %s5166_s0 }
 0x8e2   :  { %v2656_v12 = vpop.xlane.xlu0 %2655 }
 0x8e3   :  { %v2660_v14 = vsub.f32 %v2652_v6, %v2656_v12 }
 0x8e5   :  { %v2662_v16 = vmul.f32 1.442695, %v2660_v14 }
 0x8e7   :  { %5064 = vpow2.f32 %v2662_v16 }
 0x8ec   :  { %v2659_v18 = vpop.xlane.xlu1 %2658 }
 0x8ed   :  { %v2661_v19 = vsub.f32 %v2653_v7, %v2659_v18 }
 0x8ef   :  { %v2664_v56 = vmul.f32 1.442695, %v2661_v19 }
 0x8f0   :  { %v2727_v20 = vpop.permute.xlu1 %2726 }
 0x8f1   :  { %5066 = vpow2.f32 %v2664_v56  ;;  %v2732_v21 = vsel %vm1997_vm2, %v2727_v20, 0 }
 0x8f2   :  { %4527 = vmatpush3.bf16.msra.mxu1 %v2732_v21 }
 0x8f3   :  { %4538 = vmatprep.subr.bf16.mxu1 %v5164_v13 }
 0x8f4   :  { %v5065_v22 = vpop.eup %5064 }
 0x8f5   :  { %v2666_v26 = vsel %vm1969_vm5, %v5065_v22, 0.0 }
 0x8f6   :  { %2667 = vadd.xlane.f32.xlu0 %v2666_v26 }
 0x8fe   :  { %v5067_v27 = vpop.eup %5066 }
 0x8ff   :  { %v2669_v42 = vsel %vm1969_vm5, %v5067_v27, 0.0 }
 0x900   :  { %2670 = vadd.xlane.f32.xlu0 %v2669_v42 }
 0x916   :  { %2678 = vrot.lane.b32.xlu0 %v5384_v9, %s5166_s0  ;;  %v2793_v9 = vsel %vm1868_vm1, %v5472_v3, 0 }
 0x97f   :  { %v2668_v62 = vpop.xlane.xlu0 %2667 }
 0x980   :  { %5068 = vrcp.f32 %v2668_v62 }
 0x989   :  { %v2671_v51 = vpop.xlane.xlu0 %2670 }
 0x98a   :  { %5070 = vrcp.f32 %v2671_v51 }
 0x98d   :  { %v5069_v29 = vpop.eup %5068  ;;  %v2679_v30 = vpop.permute.xlu0 %2678 }
 0x98e   :  { %v2684_v31 = vsel %vm1997_vm2, %v2679_v30, 0  ;;  %v2674_v23 = vmul.f32 %v5069_v29, %v5065_v22 }
 0x98f   :  { %4521 = vmatpush3.bf16.msra.mxu0 %v2684_v31 }
 0x990   :  { %v2676_v35 = vpack.c.bf16 %v2674_v23, %v2674_v23  ;;  %4532 = vmatprep.subr.bf16.mxu0 %v5164_v13 }
 0x992   :  { %4523 = vmatmul.mubr.msk.bf16.vlgmr.msra.gmra.mxu0 %vm1969_vm5, %v2676_v35 }
 0x993   :  { %4533 = vmatpush3.bf16.xpose.msra.mxu0 %v2793_v9  ;;  %4534 = vmatprep.mubr.msk.bf16.mxu0 %vm5165_vm0, %v5164_v13 }
 0x994   :  { %4544 = vmatprep.subr.bf16.mxu0 %v5164_v13 }
 0x997   :  { %v5071_v63 = vpop.eup %5070 }
 0x998   :  { %v2675_v33 = vmul.f32 %v5071_v63, %v5067_v27 }
 0x99a   :  { %4535 = vmatmul.mubr.msk.bf16.vlgmr.msra.gmra.mxu0 %vm1868_vm1, %v5488_v25  ;;  %v2677_v38 = vpack.c.bf16 %v2675_v33, %v2675_v33 }
 0x99b   :  { %4545 = vmatpush3.bf16.msra.mxu0 %v2917_v34  ;;  %4546 = vmatprep.mubr.msk.bf16.mxu0 %vm5165_vm0, %v5164_v13 }
 0x99c   :  { %4529 = vmatmul.mubr.msk.bf16.vlgmr.msra.gmra.mxu1 %vm1969_vm5, %v2677_v38  ;;  %4556 = vmatprep.subr.bf16.mxu0 %v5164_v13 }
 0x99d   :  { %4539 = vmatpush3.bf16.xpose.msra.mxu1 %v2839_v37  ;;  %4540 = vmatprep.mubr.msk.bf16.mxu1 %vm5165_vm0, %v5164_v13 }
 0x99e   :  { %4550 = vmatprep.subr.bf16.mxu1 %v5164_v13 }
 0x9a4   :  { %4541 = vmatmul.mubr.msk.bf16.vlgmr.msra.gmra.mxu1 %vm1868_vm1, %v4301_v17 }
 0x9a5   :  { %4551 = vmatpush3.bf16.msra.mxu1 %v2963_v15  ;;  %4552 = vmatprep.mubr.msk.bf16.mxu1 %vm5165_vm0, %v5164_v13 }
 0x9a6   :  { %4562 = vmatprep.subr.bf16.mxu1 %v5164_v13 }
 0xa52   :  { %v5516_v39 = vpop.f32.mrf.mxu0 }
 0xa54   :  { %v4524_v43 = vpop.f32.mrf.mxu0 }
 0xa56   :  { %v2723_v45 = vpop.f32.mrf.mxu0 }
 0xa58   :  { %v4525_v41 = vpop.f32.mrf.mxu0 }
 0xa5a   :  { %v2829_v28 = vpop.f32.mrf.mxu0 }
 0xa5b   :  { %v2881_v48 = vmul.f32 0.125, %v2829_v28 }
 0xa5c   :  { %v5518_v46 = vpop.f32.mrf.mxu1  ;;  %v4536_v57 = vpop.f32.mrf.mxu0 }
 0xa5d   :  { %vm2883_vm10 = vcmp.ne.f32.partialorder %v2881_v48, 0.0  ;;  %v4618_v54 = vpack.i.bf16 %v5518_v46, %v5516_v39 }
 0xa5e   :  { %v4530_v6 = vpop.f32.mrf.mxu1  ;;  %v2832_v58 = vpop.f32.mrf.mxu0  ;;  %vm2885_vm11 = vmand %vm5313_vm3, %vm2883_vm10 }
 0xa5f   :  { %v2887_v59 = vsel %vm2885_vm11, %v2881_v48, -inf }
 0xa60   :  { %v2771_v60 = vpop.f32.mrf.mxu1  ;;  %v4537_v61 = vpop.f32.mrf.mxu0  ;;  %v2889_v1 = vsel %vm1969_vm5, %v2887_v59, -inf }
 0xa61   :  { %2890 = vmax.xlane.f32.xlu1 %v2889_v1 }
 0xa62   :  { %v4531_v2 = vpop.f32.mrf.mxu1 }
 0xa64   :  { %v2875_v4 = vpop.f32.mrf.mxu1 }
 0xa65   :  { %v2882_v5 = vmul.f32 0.125, %v2875_v4 }
 0xa66   :  { %v4542_v7 = vpop.f32.mrf.mxu1 }
 0xa67   :  { %vm2884_vm12 = vcmp.ne.f32.partialorder %v2882_v5, 0.0 }
 0xa68   :  { %v2878_v8 = vpop.f32.mrf.mxu1  ;;  %vm2886_vm13 = vmand %vm5313_vm3, %vm2884_vm12 }
 0xa69   :  { %v2888_v10 = vsel %vm2886_vm13, %v2882_v5, -inf }
 0xa6a   :  { %v4543_v12 = vpop.f32.mrf.mxu1  ;;  %v2892_v14 = vsel %vm1969_vm5, %v2888_v10, -inf }
 0xa6b   :  { %2893 = vmax.xlane.f32.xlu0 %v2892_v14 }
 0xa72   :  { %3057 = vrot.lane.b32.xlu1 %v4303_v32, %s5166_s0 }
 0xaea   :  { %v2891_v16 = vpop.xlane.xlu1 %2890 }
 0xaeb   :  { %v2895_v18 = vsub.f32 %v2887_v59, %v2891_v16 }
 0xaed   :  { %v2897_v19 = vmul.f32 1.442695, %v2895_v18 }
 0xaee   :  { %v3058_v51 = vpop.permute.xlu1 %3057 }
 0xaef   :  { %5072 = vpow2.f32 %v2897_v19  ;;  %v3063_v33 = vsel %vm1868_vm1, %v3058_v51, 0 }
 0xaf4   :  { %v2894_v56 = vpop.xlane.xlu0 %2893 }
 0xaf5   :  { %v2896_v20 = vsub.f32 %v2888_v10, %v2894_v56 }
 0xaf7   :  { %v2899_v21 = vmul.f32 1.442695, %v2896_v20 }
 0xaf9   :  { %5074 = vpow2.f32 %v2899_v21 }
 0xafc   :  { %v5073_v22 = vpop.eup %5072 }
 0xafd   :  { %v2901_v26 = vsel %vm1969_vm5, %v5073_v22, 0.0 }
 0xafe   :  { %2902 = vadd.xlane.f32.xlu0 %v2901_v26 }
 0xb06   :  { %v5075_v27 = vpop.eup %5074 }
 0xb07   :  { %v2904_v42 = vsel %vm1969_vm5, %v5075_v27, 0.0 }
 0xb08   :  { %2905 = vadd.xlane.f32.xlu1 %v2904_v42 }
 0xb14   :  { %3007 = vrot.lane.b32.xlu0 %v5472_v3, %s5166_s0 }
 0xb19   :  { %3005 = vrot.lane.b32.xlu1 %v5488_v25, %s5166_s0 }
 0xb1d   :  { %3055 = vrot.lane.b32.xlu1 %v4301_v17, %s5166_s0 }
 0xb87   :  { %v2903_v62 = vpop.xlane.xlu0 %2902 }
 0xb88   :  { %5076 = vrcp.f32 %v2903_v62 }
 0xb8b   :  { %v3008_v23 = vpop.permute.xlu0 %3007 }
 0xb8c   :  { %v3013_v9 = vsel %vm1868_vm1, %v3008_v23, 0 }
 0xb91   :  { %v2906_v29 = vpop.xlane.xlu1 %2905 }
 0xb92   :  { %5078 = vrcp.f32 %v2906_v29 }
 0xb95   :  { %v5077_v30 = vpop.eup %5076  ;;  %v3006_v25 = vpop.permute.xlu1 %3005 }
 0xb96   :  { %v2909_v31 = vmul.f32 %v5077_v30, %v5073_v22 }
 0xb98   :  { %v2911_v35 = vpack.c.bf16 %v2909_v31, %v2909_v31 }
 0xb99   :  { %v3056_v34 = vpop.permute.xlu1 %3055 }
 0xb9a   :  { %4547 = vmatmul.mubr.msk.bf16.vlgmr.msra.gmra.mxu0 %vm1969_vm5, %v2911_v35 }
 0xb9b   :  { %4557 = vmatpush3.bf16.xpose.msra.mxu0 %v3013_v9  ;;  %4558 = vmatprep.mubr.msk.bf16.mxu0 %vm5165_vm0, %v5164_v13  ;;  %v4947_v9 = vld [vmem:[#allocation5 + $0x90] ss:$12 sps:$4 sm:$0xff]  }
 0xb9c   :  { %4568 = vmatprep.subr.bf16.mxu0 %v5164_v13 }
 0xb9f   :  { %v5079_v3 = vpop.eup %5078 }
 0xba0   :  { %v2910_v63 = vmul.f32 %v5079_v3, %v5075_v27  ;;  %v4952_v3 = vld [vmem:[#allocation5 + $0x7c] ss:$12 sps:$4 sm:$0xff]  }
 0xba2   :  { %4559 = vmatmul.mubr.msk.bf16.vlgmr.msra.gmra.mxu0 %vm1868_vm1, %v3006_v25  ;;  %v2912_v32 = vpack.c.bf16 %v2910_v63, %v2910_v63  ;;  %v4965_v63 = vld [vmem:[#allocation5 + $0x228] ss:$12 sps:$4 sm:$0xff]   ;;  %v4967_v25 = vld [vmem:[#allocation5 + $0x22c] ss:$12 sps:$4 sm:$0xff]  }
 0xba3   :  { %4570 = vmatprep.mubr.msk.bf16.mxu0 %vm5165_vm0, %v5164_v13 }
 0xba4   :  { %4553 = vmatmul.mubr.msk.bf16.vlgmr.msra.gmra.mxu1 %vm1969_vm5, %v2912_v32  ;;  %v4973_v32 = vld [vmem:[#allocation5 + $0x214] ss:$12 sps:$4 sm:$0xff]  }
 0xba5   :  { %4563 = vmatpush3.bf16.xpose.msra.mxu1 %v3063_v33  ;;  %4564 = vmatprep.mubr.msk.bf16.mxu1 %vm5165_vm0, %v5164_v13  ;;  %v4950_v33 = vld [vmem:[#allocation5 + $0x78] ss:$12 sps:$4 sm:$0xff]  }
 0xba6   :  { %4574 = vmatprep.subr.bf16.mxu1 %v5164_v13 }
 0xbac   :  { %4565 = vmatmul.mubr.msk.bf16.vlgmr.msra.gmra.mxu1 %vm1868_vm1, %v3056_v34  ;;  %v4955_v34 = vld [vmem:[#allocation5 + $0x64] ss:$12 sps:$4 sm:$0xff]  }
 0xbad   :  { %4576 = vmatprep.mubr.msk.bf16.mxu1 %vm5165_vm0, %v5164_v13 }
 0xc5a   :  { %v5552_v38 = vpop.f32.mrf.mxu0 }
 0xc5c   :  { %v4548_v37 = vpop.f32.mrf.mxu0 }
 0xc5d   :  { %v4971_v37 = vld [vmem:[#allocation5 + $0x210] ss:$12 sps:$4 sm:$0xff]  }
 0xc5e   :  { %v2956_v17 = vpop.f32.mrf.mxu0 }
 0xc5f   :  { %v4953_v17 = vld [vmem:[#allocation5 + $0x60] ss:$12 sps:$4 sm:$0xff]  }
 0xc60   :  { %v4549_v15 = vpop.f32.mrf.mxu0 }
 0xc61   :  { %v4958_v15 = vld [vmem:[#allocation5 + $0x4c] ss:$12 sps:$4 sm:$0xff]  }
 0xc62   :  { %v3049_v43 = vpop.f32.mrf.mxu0 }
 0xc63   :  { %v3105_v45 = vmul.f32 0.125, %v3049_v43  ;;  %v4977_v43 = vld [vmem:[#allocation5 + $0x1f8] ss:$12 sps:$4 sm:$0xff]  }
 0xc64   :  { %v5554_v41 = vpop.f32.mrf.mxu1  ;;  %v4560_v28 = vpop.f32.mrf.mxu0 }
 0xc65   :  { %vm3107_vm14 = vcmp.ne.f32.partialorder %v3105_v45, 0.0  ;;  %v4956_v28 = vld [vmem:[#allocation5 + $0x48] ss:$12 sps:$4 sm:$0xff]  }
 0xc66   :  { %v4554_v48 = vpop.f32.mrf.mxu1  ;;  %v3052_v57 = vpop.f32.mrf.mxu0  ;;  %vm3109_vm15 = vmand %vm5313_vm3, %vm3107_vm14 }
 0xc67   :  { %v3111_v6 = vsel %vm3109_vm15, %v3105_v45, -inf  ;;  %v4985_v45 = vld [vmem:[#allocation5 + $0x1e4] ss:$12 sps:$4 sm:$0xff]   ;;  %v4961_v48 = vld [vmem:[#allocation5 + $0x34] ss:$12 sps:$4 sm:$0xff]  }
 0xc68   :  { %v3002_v58 = vpop.f32.mrf.mxu1  ;;  %v4561_v59 = vpop.f32.mrf.mxu0  ;;  %v3113_v60 = vsel %vm1969_vm5, %v3111_v6, -inf  ;;  %v4983_v57 = vld [vmem:[#allocation5 + $0x1e0] ss:$12 sps:$4 sm:$0xff]  }
 0xc69   :  { %3114 = vmax.xlane.f32.xlu0 %v3113_v60  ;;  %v4959_v58 = vld [vmem:[#allocation5 + $0x30] ss:$12 sps:$4 sm:$0xff]   ;;  %v4989_v60 = vld [vmem:[#allocation5 + $0x1c8] ss:$12 sps:$4 sm:$0xff]  }
 0xc6a   :  { %v4555_v61 = vpop.f32.mrf.mxu1  ;;  %v4964_v59 = vld [vmem:[#allocation5 + $0x1c] ss:$12 sps:$4 sm:$0xff]  }
 0xc6b   :  { %v4997_v61 = vld [vmem:[#allocation5 + $0x1b4] ss:$12 sps:$4 sm:$0xff]  }
 0xc6c   :  { %v3099_v1 = vpop.f32.mrf.mxu1 }
 0xc6d   :  { %v3106_v2 = vmul.f32 0.125, %v3099_v1  ;;  %v4962_v1 = vld [vmem:[#allocation5 + $0x18] ss:$12 sps:$4 sm:$0xff]  }
 0xc6e   :  { %v4566_v4 = vpop.f32.mrf.mxu1 }
 0xc6f   :  { %vm3108_vm4 = vcmp.ne.f32.partialorder %v3106_v2, 0.0  ;;  %v4995_v4 = vld [vmem:[#allocation5 + $0x1b0] ss:$12 sps:$4 sm:$0xff]  }
 0xc70   :  { %v3102_v5 = vpop.f32.mrf.mxu1  ;;  %vm3110_vm6 = vmand %vm5313_vm3, %vm3108_vm4 }
 0xc71   :  { %v3112_v7 = vsel %vm3110_vm6, %v3106_v2, -inf  ;;  %v4970_v2 = vld [vmem:[#allocation5 + $0x4] ss:$12 sps:$4 sm:$0xff]   ;;  %v5003_v5 = vld [vmem:[#allocation5 + $0x19c] ss:$12 sps:$4 sm:$0xff]  }
 0xc72   :  { %v4567_v8 = vpop.f32.mrf.mxu1  ;;  %v3116_v10 = vsel %vm1969_vm5, %v3112_v7, -inf }
 0xc73   :  { %3117 = vmax.xlane.f32.xlu1 %v3116_v10  ;;  %v4976_v8 = vld [vmem:[#allocation5 + $0x16c] ss:$12 sps:$4 sm:$0xff]  }
 0xc74   :  { %v5001_v10 = vld [vmem:[#allocation5 + $0x198] ss:$12 sps:$4 sm:$0xff]  }
 0xc84   :  { %3185 = vrot.lane.b32.xlu1 %v5506_v49, %s5166_s0 }
 0xcf2   :  { %v3115_v12 = vpop.xlane.xlu0 %3114 }
 0xcf3   :  { %v3119_v14 = vsub.f32 %v3111_v6, %v3115_v12  ;;  %v4991_v6 = vld [vmem:[#allocation5 + $0x1cc] ss:$12 sps:$4 sm:$0xff]   ;;  %v4974_v12 = vld [vmem:[#allocation5 + $0x168] ss:$12 sps:$4 sm:$0xff]  }
 0xcf5   :  { %v3121_v16 = vmul.f32 1.442695, %v3119_v14  ;;  %v4982_v14 = vld [vmem:[#allocation5 + $0x154] ss:$12 sps:$4 sm:$0xff]  }
 0xcf7   :  { %5080 = vpow2.f32 %v3121_v16  ;;  %v4980_v16 = vld [vmem:[#allocation5 + $0x150] ss:$12 sps:$4 sm:$0xff]  }
 0xcfc   :  { %v3118_v18 = vpop.xlane.xlu1 %3117 }
 0xcfd   :  { %v3120_v19 = vsub.f32 %v3112_v7, %v3118_v18  ;;  %v4968_v7 = vld [vmem:[#allocation5] ss:$12 sps:$4 sm:$0xff]   ;;  %v4988_v18 = vld [vmem:[#allocation5 + $0x13c] ss:$12 sps:$4 sm:$0xff]  }
 0xcff   :  { %v3123_v56 = vmul.f32 1.442695, %v3120_v19  ;;  %v4986_v19 = vld [vmem:[#allocation5 + $0x138] ss:$12 sps:$4 sm:$0xff]  }
 0xd00   :  { %v3186_v20 = vpop.permute.xlu1 %3185 }
 0xd01   :  { %5082 = vpow2.f32 %v3123_v56  ;;  %v3191_v50 = vsel %vm1997_vm2, %v3186_v20, 0  ;;  %v4994_v56 = vld [vmem:[#allocation5 + $0x124] ss:$12 sps:$4 sm:$0xff]   ;;  %v4992_v20 = vld [vmem:[#allocation5 + $0x120] ss:$12 sps:$4 sm:$0xff]  }
 0xd02   :  { %4575 = vmatpush3.bf16.msra.mxu1 %v3191_v50  ;;  %v5000_v50 = vld [vmem:[#allocation5 + $0x10c] ss:$12 sps:$4 sm:$0xff]  }
 0xd03   :  { %3806 = vmatprep.subr.bf16.mxu1 %v4967_v25 }
 0xd04   :  { %v5081_v21 = vpop.eup %5080 }
 0xd05   :  { %v3125_v22 = vsel %vm1969_vm5, %v5081_v21, 0.0 }
 0xd06   :  { %3126 = vadd.xlane.f32.xlu0 %v3125_v22  ;;  %v5006_v22 = vld [vmem:[#allocation5 + $0xf4] ss:$12 sps:$4 sm:$0xff]  }
 0xd0e   :  { %v5083_v26 = vpop.eup %5082 }
 0xd0f   :  { %v3128_v27 = vsel %vm1969_vm5, %v5083_v26, 0.0 }
 0xd10   :  { %3129 = vadd.xlane.f32.xlu0 %v3128_v27  ;;  %v5009_v27 = vld [vmem:[#allocation5 + $0x184] ss:$12 sps:$4 sm:$0xff]  }
 0xd26   :  { %3137 = vrot.lane.b32.xlu0 %v5484_v11, %s5166_s0 }
 0xd2a   :  { %4624 = vrot.lane.b32.xlu0 %v4623_v53, %s5166_s0  ;;  %v4949_v53 = vld [vmem:[#allocation5 + $0x94] ss:$12 sps:$4 sm:$0xff]  }
 0xd8f   :  { %v3127_v49 = vpop.xlane.xlu0 %3126 }
 0xd90   :  { %5084 = vrcp.f32 %v3127_v49 }
 0xd99   :  { %v3130_v42 = vpop.xlane.xlu0 %3129 }
 0xd9a   :  { %5086 = vrcp.f32 %v3130_v42  ;;  %v5007_v42 = vld [vmem:[#allocation5 + $0x180] ss:$12 sps:$4 sm:$0xff]  }
 0xd9d   :  { %v5085_v62 = vpop.eup %5084  ;;  %v3138_v51 = vpop.permute.xlu0 %3137 }
 0xd9e   :  { %v3143_v29 = vsel %vm1997_vm2, %v3138_v51, 0  ;;  %v3133_v30 = vmul.f32 %v5085_v62, %v5081_v21  ;;  %v4998_v21 = vld [vmem:[#allocation5 + $0x108] ss:$12 sps:$4 sm:$0xff]   ;;  %v5010_v51 = vld [vmem:[#allocation5 + $0xd8] ss:$12 sps:$4 sm:$0xff]  }
 0xd9f   :  { %4569 = vmatpush3.bf16.msra.mxu0 %v3143_v29  ;;  %v5012_v62 = vld [vmem:[#allocation5 + $0xdc] ss:$12 sps:$4 sm:$0xff]  }
 0xda0   :  { %v3135_v31 = vpack.c.bf16 %v3133_v30, %v3133_v30  ;;  %3763 = vmatprep.subr.bf16.mxu0 %v4946_v52  ;;  %v5013_v30 = vld [vmem:[#allocation5 + $0x170] ss:$12 sps:$4 sm:$0xff]  }
 0xda2   :  { %4571 = vmatmul.mubr.msk.bf16.vlgmr.msra.gmra.mxu0 %vm1969_vm5, %v3135_v31 }
 0xda3   :  { %3764 = vmatpush1.bf16.msra.mxu0 %v4944_v40 }
 0xda4   :  { %3765 = vmatprep.subr.bf16.mxu0 %v4949_v53 }
 0xda7   :  { %v5087_v23 = vpop.eup %5086  ;;  %3766 = vmatpush1.bf16.msra.mxu0 %v4947_v9 }
 0xda8   :  { %v3134_v11 = vmul.f32 %v5087_v23, %v5083_v26  ;;  %3767 = vmatprep.subr.bf16.mxu0 %v4952_v3  ;;  %v5004_v26 = vld [vmem:[#allocation5 + $0xf0] ss:$12 sps:$4 sm:$0xff]   ;;  %v5014_v23 = vld [vmem:[#allocation5 + $0xc0] ss:$12 sps:$4 sm:$0xff]  }
 0xdaa   :  { %v3136_v35 = vpack.c.bf16 %v3134_v11, %v3134_v11  ;;  %v5016_v11 = vld [vmem:[#allocation5 + $0xc4] ss:$12 sps:$4 sm:$0xff]  }
 0xdab   :  { %3768 = vmatpush1.bf16.msra.mxu0 %v4950_v33 }
 0xdac   :  { %4577 = vmatmul.mubr.msk.bf16.vlgmr.msra.gmra.mxu1 %vm1969_vm5, %v3136_v35  ;;  %3769 = vmatprep.subr.bf16.mxu0 %v4955_v34 }
 0xdad   :  { %3838 = vmatprep.mubr.bf16.mxu1 %v5163_v0  ;;  %3807 = vmatpush1.bf16.msra.mxu1 %v4965_v63  ;;  %v4979_v0 = vld [vmem:[#allocation5 + $0x1fc] ss:$12 sps:$4 sm:$0xff]   ;;  %v4625_v63 = vpop.permute.xlu0 %4624 }
 0xdae   :  { %3808 = vmatprep.subr.bf16.mxu1 %v4973_v32  ;;  %v4627_v34 = vunpack.i.h.bf16 %v4625_v63 }
 0xdaf   :  { %3770 = vmatpush1.bf16.msra.mxu0 %v4953_v17 }
 0xdb0   :  { %3771 = vmatprep.subr.bf16.mxu0 %v4958_v15  ;;  %v5017_v15 = vld [vmem:[#allocation5 + $0xb0] ss:$12 sps:$4 sm:$0xff]   ;;  %v3258_v46 = vsel %vm1868_vm1, %v5358_v55, %v4627_v34  ;;  %v5023_v55 = vld [vmem:[#allocation5 + $0x218] ss:$12 sps:$4 sm:$0xff]  }
 0xdb1   :  { %3809 = vmatpush1.bf16.msra.mxu1 %v4971_v37  ;;  %v4626_v37 = vunpack.i.l.bf16 %v4625_v63 }
 0xdb2   :  { %3810 = vmatprep.subr.bf16.mxu1 %v4979_v0 }
 0xdb3   :  { %3772 = vmatpush1.bf16.msra.mxu0 %v4956_v28  ;;  %v5018_v28 = vld [vmem:[#allocation5 + $0x158] ss:$12 sps:$4 sm:$0xff]  }
 0xdb4   :  { %3773 = vmatprep.subr.bf16.mxu0 %v4961_v48 }
 0xdb5   :  { %3811 = vmatpush1.bf16.msra.mxu1 %v4977_v43 }
 0xdb6   :  { %3812 = vmatprep.subr.bf16.mxu1 %v4985_v45 }
 0xdb7   :  { %3774 = vmatpush1.bf16.msra.mxu0 %v4959_v58  ;;  %v5020_v58 = vld [vmem:[#allocation5 + $0x230] ss:$12 sps:$4 sm:$0xff]  }
 0xdb8   :  { %3775 = vmatprep.subr.bf16.mxu0 %v4964_v59  ;;  %v5021_v59 = vld [vmem:[#allocation5 + $0x140] ss:$12 sps:$4 sm:$0xff]  }
 0xdb9   :  { %3813 = vmatpush1.bf16.msra.mxu1 %v4983_v57  ;;  %v5019_v57 = vld [vmem:[#allocation5 + $0x98] ss:$12 sps:$4 sm:$0xff]  }
 0xdba   :  { %3814 = vmatprep.subr.bf16.mxu1 %v4991_v6 }
 0xdbb   :  { %3776 = vmatpush1.bf16.msra.mxu0 %v4962_v1  ;;  %v5027_v1 = vld [vmem:[#allocation5 + $0x110] ss:$12 sps:$4 sm:$0xff]  }
 0xdbc   :  { %3777 = vmatprep.subr.bf16.mxu0 %v4970_v2  ;;  %v5028_v2 = vld [vmem:[#allocation5 + $0x50] ss:$12 sps:$4 sm:$0xff]  }
 0xdbd   :  { %3815 = vmatpush1.bf16.msra.mxu1 %v4989_v60 }
 0xdbe   :  { %3816 = vmatprep.subr.bf16.mxu1 %v4997_v61  ;;  %v5024_v61 = vld [vmem:[#allocation5 + $0x128] ss:$12 sps:$4 sm:$0xff]  }
 0xdbf   :  { %3778 = vmatpush1.bf16.msra.mxu0 %v4968_v7  ;;  %v5031_v7 = vld [vmem:[#allocation5 + $0x38] ss:$12 sps:$4 sm:$0xff]  }
 0xdc0   :  { %3779 = vmatprep.subr.bf16.mxu0 %v4976_v8  ;;  %v5032_v8 = vld [vmem:[#allocation5 + $0x1d0] ss:$12 sps:$4 sm:$0xff]  }
 0xdc1   :  { %3817 = vmatpush1.bf16.msra.mxu1 %v4995_v4  ;;  %v5029_v4 = vld [vmem:[#allocation5 + $0x1e8] ss:$12 sps:$4 sm:$0xff]  }
 0xdc2   :  { %3818 = vmatprep.subr.bf16.mxu1 %v5003_v5  ;;  %v5030_v5 = vld [vmem:[#allocation5 + $0xf8] ss:$12 sps:$4 sm:$0xff]  }
 0xdc3   :  { %3780 = vmatpush2.bf16.msra.mxu0 %v4974_v12  ;;  %v5034_v12 = vld [vmem:[#allocation5 + $0x20] ss:$12 sps:$4 sm:$0xff]  }
 0xdc4   :  { %3781 = vmatprep.subr.bf16.mxu0 %v4982_v14  ;;  %v5035_v14 = vld [vmem:[#allocation5 + $0x1b8] ss:$12 sps:$4 sm:$0xff]  }
 0xdc5   :  { %3819 = vmatpush1.bf16.msra.mxu1 %v5001_v10  ;;  %v5033_v10 = vld [vmem:[#allocation5 + $0xe0] ss:$12 sps:$4 sm:$0xff]  }
 0xdc6   :  { %3820 = vmatprep.subr.bf16.mxu1 %v5009_v27 }
 0xdc7   :  { %3782 = vmatpush2.bf16.msra.mxu0 %v4980_v16  ;;  %v5036_v16 = vld [vmem:[#allocation5 + $0xc8] ss:$12 sps:$4 sm:$0xff]  }
 0xdc8   :  { %3783 = vmatprep.subr.bf16.mxu0 %v4988_v18  ;;  %v5037_v18 = vld [vmem:[#allocation5 + $0x8] ss:$12 sps:$4 sm:$0xff]  }
 0xdc9   :  { %3821 = vmatpush1.bf16.msra.mxu1 %v5007_v42 }
 0xdca   :  { %4385 = vmatprep.subr.bf16.mxu1 %v5013_v30 }
 0xdcb   :  { %3784 = vmatpush2.bf16.msra.mxu0 %v4986_v19  ;;  %v5038_v19 = vld [vmem:[#allocation5 + $0x1a0] ss:$12 sps:$4 sm:$0xff]  }
 0xdcc   :  { %3785 = vmatprep.subr.bf16.mxu0 %v4994_v56  ;;  %v5039_v56 = vld [vmem:[#allocation5 + $0x188] ss:$12 sps:$4 sm:$0xff]  }
 0xdcf   :  { %3786 = vmatpush2.bf16.msra.mxu0 %v4992_v20  ;;  %v3366_v20 = vsub.s32 0, %v5310_v44 }
 0xdd0   :  { %3787 = vmatprep.subr.bf16.mxu0 %v5000_v50  ;;  %v3362_v50 = vld [vmem:[%s5620_s3] sm:$0x7]  ;;  %s5167_s3 = smov [#allocation7]  }
 0xdd1   :  { %s3942_s15 = sshll.u32 %s5167_s3, 4  ;;  %s3943_s15 = int_to_ptr.vmem [resolvable:$true] %s3942_s15 }
 0xdd2   :  { %s5131_s16 = scalar_lea.vmem %s3943_s15, 768  ;;  %p5136_p11 = scmp.lt.s32.totalorder %s3943_s15, %s3943_s15 }
 0xdd3   :  { %3788 = vmatpush2.bf16.msra.mxu0 %v4998_v21  ;;  %v3370_v21 = vsub.s32 1, %v5310_v44  ;;  %p5132_p10 = scmp.ne.s32.totalorder %s3943_s15, %s5131_s16  ;;  %p5137_p12 = scmp.lt.s32.totalorder %s5131_s16, %s5131_s16 }
 0xdd4   :  { %3789 = vmatprep.subr.bf16.mxu0 %v5006_v22 }
 0xdd5   :  { %v3371_v27 = vrot.slane %v3362_v50, %v3370_v21  ;;  %p5138_p13 = por %p5137_p12, %p5136_p11 }
 0xdd7   :  { %3790 = vmatpush2.bf16.msra.mxu0 %v5004_v26  ;;  %v3367_v26 = vrot.slane %v3362_v50, %v3366_v20  ;;  %p5139_p0 = pnand %p5138_p13, %p5132_p10 }
 0xdd8   :  { %3791 = vmatprep.subr.bf16.mxu0 %v5012_v62 }
 0xddb   :  { %3792 = vmatpush2.bf16.msra.mxu0 %v5010_v51 }
 0xddc   :  { %3793 = vmatprep.subr.bf16.mxu0 %v5016_v11 }
 0xddf   :  { %3794 = vmatpush2.bf16.msra.mxu0 %v5014_v23 }
 0xde0   :  { %4580 = vmatprep.subr.bf16.mxu0 %v5164_v13 }
 0xe62   :  { %v3179_v49 = vpop.f32.mrf.mxu0 }
 0xe64   :  { %v4572_v29 = vpop.f32.mrf.mxu0 }
 0xe66   :  { %v3182_v31 = vpop.f32.mrf.mxu0 }
 0xe68   :  { %v4573_v35 = vpop.f32.mrf.mxu0 }
 0xe6c   :  { %v3227_v40 = vpop.f32.mrf.mxu1 }
 0xe6d   :  { %v4613_v52 = vpack.i.bf16 %v3227_v40, %v3179_v49 }
 0xe6e   :  { %v4578_v53 = vpop.f32.mrf.mxu1 }
 0xe6f   :  { %4614 = vrot.lane.b32.xlu1 %v4613_v52, %s5166_s0 }
 0xe70   :  { %v3230_v9 = vpop.f32.mrf.mxu1 }
 0xe72   :  { %v4579_v3 = vpop.f32.mrf.mxu1 }
 0xe73   :  { %4619 = vrot.lane.b32.xlu1 %v4618_v54, %s5166_s0  ;;  %v3257_v54 = vsel %vm1868_vm1, %v5353_v36, %v4626_v37  ;;  %v5022_v36 = vld [vmem:[#allocation5 + $0x80] ss:$12 sps:$4 sm:$0xff]   ;;  %v3374_v3 = vsub.s32 2, %v5310_v44 }
 0xe74   :  { %v3263_v60 = vpack.c.bf16 %v3258_v46, %v3257_v54 }
 0xee1   :  { %v4615_v25 = vpop.permute.xlu1 %4614 }
 0xee2   :  { %v4617_v32 = vunpack.i.h.bf16 %v4615_v25  ;;  %v4616_v33 = vunpack.i.l.bf16 %v4615_v25  ;;  %v3375_v25 = vrot.slane %v3362_v50, %v3374_v3 }
 0xee4   :  { %v3262_v0 = vsel %vm1868_vm1, %v5554_v41, %v4617_v32  ;;  %v3261_v17 = vsel %vm1868_vm1, %v5552_v38, %v4616_v33 }
 0xee5   :  { %v5587_v43 = vpack.c.bf16 %v3262_v0, %v3261_v17  ;;  %v4620_v45 = vpop.permute.xlu1 %4619 }
 0xee6   :  { %v4622_v48 = vunpack.i.h.bf16 %v4620_v45  ;;  %v4621_v39 = vunpack.i.l.bf16 %v4620_v45 }
 0xee7   :  { %3839 = vmatmul.mubr.bf16.vlgmr.msra.gmra.mxu1 %v5587_v43 }
 0xee8   :  { %4386 = vmatpush3.bf16.msra.mxu1 %v5017_v15  ;;  %v3259_v41 = vsel %vm1868_vm1, %v5452_v24, %v4621_v39  ;;  %v3260_v38 = vsel %vm1868_vm1, %v5454_v47, %v4622_v48  ;;  %v5025_v24 = vld [vmem:[#allocation5 + $0x68] ss:$12 sps:$4 sm:$0xff]   ;;  %v5026_v47 = vld [vmem:[#allocation5 + $0x200] ss:$12 sps:$4 sm:$0xff]  }
 0xee9   :  { %4387 = vmatprep.subr.bf16.mxu1 %v5018_v28  ;;  %v3264_v6 = vpack.c.bf16 %v3260_v38, %v3259_v41 }
 0xeeb   :  { %3795 = vmatprep.mubr.bf16.mxu0 %v3264_v6  ;;  %3881 = vmatprep.mubr.bf16.mxu1 %v3264_v6 }
 0xeec   :  { %4388 = vmatpush3.bf16.msra.mxu1 %v5019_v57  ;;  %3796 = vmatmul.mubr.bf16.vlgmr.msra.gmra.mxu0 %v3263_v60 }
 0xeed   :  { %4581 = vmatpush3.bf16.msra.mxu0 %v5020_v58  ;;  %4389 = vmatprep.subr.bf16.mxu1 %v5021_v59 }
 0xeee   :  { %4582 = vmatprep.subr.bf16.mxu0 %v5164_v13  ;;  %4596 = vmatprep.mubr.msk.bf16.mxu0 %vm5165_vm0, %v5164_v13 }
 0xef0   :  { %4390 = vmatpush3.bf16.msra.mxu1 %v5022_v36 }
 0xef1   :  { %4583 = vmatpush3.bf16.msra.mxu0 %v5023_v55  ;;  %4391 = vmatprep.subr.bf16.mxu1 %v5024_v61 }
 0xef2   :  { %4584 = vmatprep.subr.bf16.mxu0 %v5164_v13 }
 0xef4   :  { %4392 = vmatpush3.bf16.msra.mxu1 %v5025_v24 }
 0xef5   :  { %4585 = vmatpush3.bf16.msra.mxu0 %v5026_v47  ;;  %4393 = vmatprep.subr.bf16.mxu1 %v5027_v1 }
 0xef6   :  { %4586 = vmatprep.subr.bf16.mxu0 %v5164_v13 }
 0xef8   :  { %4394 = vmatpush3.bf16.msra.mxu1 %v5028_v2 }
 0xef9   :  { %4587 = vmatpush3.bf16.msra.mxu0 %v5029_v4  ;;  %4395 = vmatprep.subr.bf16.mxu1 %v5030_v5 }
 0xefa   :  { %4588 = vmatprep.subr.bf16.mxu0 %v5164_v13 }
 0xefc   :  { %4396 = vmatpush3.bf16.msra.mxu1 %v5031_v7 }
 0xefd   :  { %4589 = vmatpush3.bf16.msra.mxu0 %v5032_v8  ;;  %4397 = vmatprep.subr.bf16.mxu1 %v5033_v10 }
 0xefe   :  { %4590 = vmatprep.subr.bf16.mxu0 %v5164_v13 }
 0xf00   :  { %4398 = vmatpush3.bf16.msra.mxu1 %v5034_v12 }
 0xf01   :  { %4591 = vmatpush3.bf16.msra.mxu0 %v5035_v14  ;;  %4399 = vmatprep.subr.bf16.mxu1 %v5036_v16 }
 0xf02   :  { %4592 = vmatprep.subr.bf16.mxu0 %v5164_v13 }
 0xf04   :  { %4400 = vmatpush3.bf16.msra.mxu1 %v5037_v18 }
 0xf05   :  { %4593 = vmatpush3.bf16.msra.mxu0 %v5038_v19 }
 0xf06   :  { %4594 = vmatprep.subr.bf16.mxu0 %v5164_v13 }
 0xf07   :  { %3882 = vmatmul.mubr.bf16.vlgmr.msra.gmra.mxu1 %v3263_v60 }
 0xf09   :  { %4595 = vmatpush3.bf16.msra.mxu0 %v5039_v56 }
 0xf0c   :  { %4597 = vmatmul.mubr.bf16.vlgmr.msra.gmra.mxu0 %v5587_v43 }
 0xfa7   :  { %v3840_v22 = vpop.f32.mrf.mxu1 }
 0xfa9   :  { %v3842_v49 = vpop.f32.mrf.mxu1 }
 0xfab   :  { %v3844_v30 = vpop.f32.mrf.mxu1 }
 0xfac   :  { %v3797_v42 = vpop.f32.mrf.mxu0 }
 0xfad   :  { %v3798_v62 = vadd.f32 %v3797_v42, %v3367_v26  ;;  %v3846_v53 = vpop.f32.mrf.mxu1 }
 0xfae   :  { %v3799_v51 = vpop.f32.mrf.mxu0 }
 0xfaf   :  { %v3841_v13 = vadd.f32 %v3840_v22, %v3798_v62  ;;  %v3800_v29 = vadd.f32 %v3799_v51, %v3371_v27 }
 0xfb0   :  { %v3801_v31 = vpop.f32.mrf.mxu0 }
 0xfb1   :  { %3931 = vst [vmem:[#allocation7] sm:$0xff] %v3841_v13  ;;  %v3843_v23 = vadd.f32 %v3842_v49, %v3800_v29  ;;  %v3802_v11 = vadd.f32 %v3801_v31, %v3367_v26 }
 0xfb2   :  { %v3803_v35 = vpop.f32.mrf.mxu0 }
 0xfb3   :  { %3932 = vst [vmem:[#allocation7 + $0x8] sm:$0xff] %v3843_v23  ;;  %v3845_v40 = vadd.f32 %v3844_v30, %v3802_v11  ;;  %v3804_v52 = vadd.f32 %v3803_v35, %v3371_v27 }
 0xfb5   :  { %3934 = vst [vmem:[#allocation7 + $0x18] sm:$0xff] %v3845_v40  ;;  %v3847_v9 = vadd.f32 %v3846_v53, %v3804_v52 }
 0xfb7   :  { %3935 = vst [vmem:[#allocation7 + $0x20] sm:$0xff] %v3847_v9 }
 0xfc7   :  { %v4401_v63 = vpop.f32.mrf.mxu1 }
 0xfc9   :  { %v4402_v32 = vpop.f32.mrf.mxu1 }
 0xfca   :  { %v4403_v33 = vadd.f32 %v4402_v32, %v4401_v63 }
 0xfcb   :  { %v4404_v34 = vpop.f32.mrf.mxu1 }
 0xfcc   :  { %v3884_v37 = vadd.f32 %v4403_v33, %v3375_v25  ;;  %v3924_v0 = vpop.f32.mrf.mxu0 }
 0xfcd   :  { %v4405_v17 = vpop.f32.mrf.mxu1 }
 0xfce   :  { %v3925_v15 = vadd.f32 %v3924_v0, %v3884_v37  ;;  %v4406_v43 = vadd.f32 %v4405_v17, %v4404_v34  ;;  %v4598_v45 = vpop.f32.mrf.mxu0 }
 0xfd0   :  { %3933 = vst [vmem:[#allocation7 + $0x10] sm:$0xff] %v3925_v15  ;;  %v3887_v28 = vadd.f32 %v4406_v43, %v3375_v25  ;;  %v3927_v48 = vpop.f32.mrf.mxu0 }
 0xfd2   :  { %v3928_v39 = vadd.f32 %v3927_v48, %v3887_v28  ;;  %v4599_v46 = vpop.f32.mrf.mxu0 }
 0xfd4   :  { %3936 = vst [vmem:[#allocation7 + $0x28] sm:$0xff] %v3928_v39 }
 0xfd5   :  { %5142 = shalt.err (!%p5139_p0)
}
 0xfd6   :  { %s5168_s17 = smov 384   ;;  %s5169_s18 = smov 24  }
 0xfd7   :  { %3948 = dma.vmem_to_hbm [thread:$0]  %s3943_s15, 768, %s5621_s4, [#allocation4], %s5168_s17, %s5168_s17, %s5169_s18  }
 0xfd8   :  { %5155 = dma.done.wait [#allocation4], 768  }
 0xfd9   :  { %5156 = vsyncadd [#allocation4], 4294966528 }
 0xfda   :  { %3952 = vsyncpa [#allocation3], 1 }
 0xfdb   :  { %3953 = vsyncpa [#allocation6], 1 }
 0xfdc   :  { %3954 = vsyncpa [#allocation4], 1 }

</bundles_post_ra>
